<compile_context>
chip_gen: v7x
topology: tpu7x:2x2x1
jax: 0.10.0
libtpu: 0.0.40
codegen_flags: <defaults>
</compile_context>

<pallas_src>
import functools

import jax
import jax.numpy as jnp
from jax import lax
from jax.experimental import pallas as pl
from jax.experimental.pallas import tpu as pltpu


def _layernorm(y, gamma, beta, eps):
    mu = jnp.mean(y, axis=-1, keepdims=True)
    var = jnp.mean((y - mu) * (y - mu), axis=-1, keepdims=True)
    return (y - mu) * lax.rsqrt(var + eps) * gamma + beta


def encoder_layer_kernel(x_ref, bias_ref, wqkv_ref, wo_ref, w1_ref, w2_ref,
                         slab_ref, o_ref, *, num_head, eps):
    """One grid step == one full EncoderLayer applied to one (b_tile, S, D) batch tile."""
    layer = pl.program_id(1)          # layer axis is innermost -> o_ref resident across it
    Bt, S, D = x_ref.shape
    F = w1_ref.shape[-1]
    dk = D // num_head
    scale = 1.0 / float(dk) ** 0.5

    # Layer 0 seeds the resident output block with the encoder input; later layers
    # read the previous layer's activation straight out of VMEM (the output block
    # index is constant across the layer axis, so it is never flushed in between).
    @pl.when(layer == 0)
    def _():
        o_ref[...] = x_ref[...]

    h_in = o_ref[...].astype(jnp.float32)            # (Bt, S, D) layer input
    xf = h_in.reshape(Bt * S, D)                     # fold batch -> full sublanes
    xb = xf.astype(jnp.bfloat16)                     # bf16 operands for the MXU

    slab = slab_ref[0]                               # (10, max(D, F)) packed small params (f32)
    bq, bk, bv = slab[0:1, :D], slab[1:2, :D], slab[2:3, :D]
    bo = slab[3:4, :D]
    ln1_g, ln1_b = slab[4:5, :D], slab[5:6, :D]
    b2 = slab[6:7, :D]
    ln2_g, ln2_b = slab[7:8, :D], slab[8:9, :D]
    b1 = slab[9:10, :F]

    # ------------------------- multi-head self-attention -------------------------
    wqkv = wqkv_ref[0]                               # (3, D, D) bf16
    q = jnp.dot(xb, wqkv[0], preferred_element_type=jnp.float32) + bq    # (Bt*S, D)
    k = jnp.dot(xb, wqkv[1], preferred_element_type=jnp.float32) + bk
    v = jnp.dot(xb, wqkv[2], preferred_element_type=jnp.float32) + bv
    q = q.reshape(Bt, S, D).astype(jnp.bfloat16)
    k = k.reshape(Bt, S, D).astype(jnp.bfloat16)
    v = v.reshape(Bt, S, D).astype(jnp.bfloat16)

    # Layer-invariant key-pad bias (computed ONCE in the wrapper, DMA'd once per
    # batch tile); applied as a (Bt, 1, Sk) broadcast add -- no (B, Sq, Sk) bias
    # tensor is ever materialized.
    # TODO(synk): the original PyTorch masked_fill broadcast of a (B,1,S,D) mask
    # into (B,H,S,S) scores is shape-inconsistent for 3-D float inputs; we apply
    # the intended key-pad semantics (a no-op for continuous inputs).
    bias = bias_ref[...]                             # (Bt, 1, S) f32

    wo = wo_ref[0]                                   # (D, D) bf16
    attn = jnp.zeros((Bt * S, D), jnp.float32)
    # TODO(synk): replace this static head loop with head-batched dot_generals
    # (multi batch dims + two-axis-contraction output projection) once that
    # lowering is confirmed; each head below is a single-batch-dim batched matmul.
    for h in range(num_head):
        lo = h * dk
        qh = q[:, :, lo:lo + dk]                     # (Bt, S, dk) bf16
        kh = k[:, :, lo:lo + dk]
        vh = v[:, :, lo:lo + dk]
        s = lax.dot_general(qh, kh, (((2,), (2,)), ((0,), (0,))),        # q @ k^T, no .T
                            preferred_element_type=jnp.float32) * scale
        s = s + bias                                 # (Bt, Sq, Sk) + (Bt, 1, Sk) broadcast
        m = jnp.max(s, axis=-1, keepdims=True)
        e = jnp.exp(s - m)
        p = e * pl.reciprocal(jnp.sum(e, axis=-1, keepdims=True), approx=False)
        ctx = lax.dot_general(p.astype(jnp.bfloat16), vh, (((2,), (1,)), ((0,), (0,))),
                              preferred_element_type=jnp.float32)        # (Bt, S, dk)
        # Per-head slice of the output projection accumulated in f32 (no head concat).
        attn = attn + jnp.dot(ctx.reshape(Bt * S, dk).astype(jnp.bfloat16),
                              wo[lo:lo + dk, :], preferred_element_type=jnp.float32)

    y = _layernorm(attn + bo + xf, ln1_g, ln1_b, eps)                    # (Bt*S, D) f32

    # --------------------------- position-wise FFN --------------------------------
    hmid = jnp.dot(y.astype(jnp.bfloat16), w1_ref[0],
                   preferred_element_type=jnp.float32) + b1
    hmid = jnp.maximum(hmid, 0.0)                    # ReLU; Dropout == identity (inference)
    ff = jnp.dot(hmid.astype(jnp.bfloat16), w2_ref[0],
                 preferred_element_type=jnp.float32) + b2
    z = _layernorm(ff + y, ln2_g, ln2_b, eps)

    o_ref[...] = z.reshape(Bt, S, D).astype(o_ref.dtype)


def encoder_forward(x, params, num_head, *, b_tile=None):
    """Pallas equivalent of Encoder.forward for pre-embedded input (B, S, D).

    max_seq_len=None and add_pe=False (the Encoder defaults) => no Embeddings / PE.
    Returns (enc_output, pad_mask) like the PyTorch module.
    """
    B, S, D = x.shape
    n_layers = params["wqkv"].shape[0]
    F = params["w1"].shape[-1]
    W = params["slab"].shape[-1]
    if b_tile is None:
        b_tile = B
    assert B % b_tile == 0
    nb = B // b_tile

    # Layer-invariant additive key-pad bias, hoisted out of the per-layer grid:
    # key j is "pad" iff x[b, j, :] == 0 everywhere (PyTorch builds the mask once
    # from x and reuses it in every layer).
    key_pad_bias = jnp.where(jnp.all(x == 0.0, axis=-1),
                             jnp.float32(-1e9), jnp.float32(0.0))[:, None, :]  # (B,1,S)

    # Explicit VMEM budget: double-buffered bf16 per-layer weights + resident
    # activation tile + q/k/v/y/ff working set + per-head scores, with slack.
    # Capped at 48 MiB to keep headroom under v7x's 64 MiB physical VMEM.
    per_layer_w = (3 * D * D + D * D + D * F + F * D) * 2 + 10 * W * 4
    act_bytes = b_tile * S * D * 4
    working = 8 * act_bytes + 2 * b_tile * S * S * 4
    vmem_limit = int(min(max(2 * per_layer_w + 2 * act_bytes + working + (4 << 20),
                             16 << 20), 48 << 20))

    kern = functools.partial(encoder_layer_kernel, num_head=num_head, eps=1e-5)
    out = pl.pallas_call(
        kern,
        out_shape=jax.ShapeDtypeStruct((B, S, D), x.dtype),
        grid=(nb, n_layers),                                        # (batch tiles, layers)
        in_specs=[
            pl.BlockSpec((b_tile, S, D), lambda b, l: (b, 0, 0)),   # encoder input (layer-0 seed)
            pl.BlockSpec((b_tile, 1, S), lambda b, l: (b, 0, 0)),   # hoisted key-pad bias
            pl.BlockSpec((1, 3, D, D), lambda b, l: (l, 0, 0, 0)),  # stacked Wq/Wk/Wv (bf16)
            pl.BlockSpec((1, D, D), lambda b, l: (l, 0, 0)),        # Wo (bf16)
            pl.BlockSpec((1, D, F), lambda b, l: (l, 0, 0)),        # W1 (bf16)
            pl.BlockSpec((1, F, D), lambda b, l: (l, 0, 0)),        # W2 (bf16)
            pl.BlockSpec((1, 10, W), lambda b, l: (l, 0, 0)),       # packed biases/LN/b1 (f32)
        ],
        out_specs=pl.BlockSpec((b_tile, S, D), lambda b, l: (b, 0, 0)),  # resident over layers
        compiler_params=pltpu.CompilerParams(
            dimension_semantics=("parallel", "arbitrary"),          # batch tiles || , layers seq
            vmem_limit_bytes=vmem_limit),
    )(x, key_pad_bias, params["wqkv"], params["wo"], params["w1"], params["w2"],
      params["slab"])

    # get_attn_pad_mask(x): (x == 0).unsqueeze(1) -> (B, 1, S, D) boolean.
    pad_mask = (x == 0)[:, None, :, :]
    return out, pad_mask


def init_layer_params(key, d_model, d_ff):
    """Torch-style Linear init U(-1/sqrt(fan_in), 1/sqrt(fan_in)); weights stored as
    (in, out) so kernels compute x @ W + b.  Matmul weights are stored bf16
    (MXU-native); all small per-layer vectors (incl. b1) are packed f32 into one
    (10, max(D, d_ff)) slab => a single small DMA per grid step."""
    def lin(k, fin, fout):
        kw, kb = jax.random.split(k)
        bound = 1.0 / (fin ** 0.5)
        w = jax.random.uniform(kw, (fin, fout), jnp.float32, -bound, bound)
        b = jax.random.uniform(kb, (fout,), jnp.float32, -bound, bound)
        return w, b

    ks = jax.random.split(key, 6)
    wq, bq = lin(ks[0], d_model, d_model)
    wk, bk = lin(ks[1], d_model, d_model)
    wv, bv = lin(ks[2], d_model, d_model)
    wo, bo = lin(ks[3], d_model, d_model)
    w1, b1 = lin(ks[4], d_model, d_ff)
    w2, b2 = lin(ks[5], d_ff, d_model)
    ones = jnp.ones((d_model,), jnp.float32)
    zeros = jnp.zeros((d_model,), jnp.float32)

    W = max(d_model, d_ff)
    pad = lambda v: jnp.pad(v, (0, W - v.shape[0]))
    # Rows: bq bk bv bo ln1_g ln1_b b2 ln2_g ln2_b b1.
    slab = jnp.stack([pad(bq), pad(bk), pad(bv), pad(bo), pad(ones), pad(zeros),
                      pad(b2), pad(ones), pad(zeros), pad(b1)], axis=0)      # (10, W)
    return dict(wqkv=jnp.stack([wq, wk, wv], axis=0).astype(jnp.bfloat16),   # (3, D, D)
                wo=wo.astype(jnp.bfloat16),
                w1=w1.astype(jnp.bfloat16),
                w2=w2.astype(jnp.bfloat16),
                slab=slab.astype(jnp.float32))


def stack_layers(layer_p, n_layers):
    # clones(EncoderLayer(...), N) deep-copies one instance -> identical initial weights.
    return {kk: jnp.stack([vv] * n_layers, axis=0) for kk, vv in layer_p.items()}


def encoder_reference(x, params, num_head):
    """Pure-JAX reference of the inference forward pass (same mask semantics and the
    same bf16-operand / f32-accumulation matmul precision as the kernel)."""
    B, S, D = x.shape
    n_layers = params["wqkv"].shape[0]
    F = params["w1"].shape[-1]
    dk = D // num_head
    eps = 1e-5
    bias = jnp.where(jnp.all(x == 0.0, axis=-1), -1e9, 0.0)[:, None, None, :]  # (B,1,1,Sk)

    def mm(a, b):
        return jnp.dot(a.astype(jnp.bfloat16), b.astype(jnp.bfloat16),
                       preferred_element_type=jnp.float32)

    def ln(y, g, b):
        mu = y.mean(-1, keepdims=True)
        var = ((y - mu) ** 2).mean(-1, keepdims=True)
        return (y - mu) * jax.lax.rsqrt(var + eps) * g + b

    h = x.astype(jnp.float32)
    for l in range(n_layers):
        wq, wk, wv = params["wqkv"][l]
        wo = params["wo"][l]
        slab = params["slab"][l]
        bq, bk, bv, bo = slab[0, :D], slab[1, :D], slab[2, :D], slab[3, :D]
        g1, be1, b2 = slab[4, :D], slab[5, :D], slab[6, :D]
        g2, be2 = slab[7, :D], slab[8, :D]
        b1 = slab[9, :F]
        w1, w2 = params["w1"][l], params["w2"][l]

        hf = h.reshape(B * S, D)
        q = (mm(hf, wq) + bq).reshape(B, S, num_head, dk).transpose(0, 2, 1, 3)
        k = (mm(hf, wk) + bk).reshape(B, S, num_head, dk).transpose(0, 2, 1, 3)
        v = (mm(hf, wv) + bv).reshape(B, S, num_head, dk).transpose(0, 2, 1, 3)
        s = jnp.einsum("bhqd,bhkd->bhqk", q.astype(jnp.bfloat16), k.astype(jnp.bfloat16),
                       preferred_element_type=jnp.float32) / (dk ** 0.5) + bias
        p = jax.nn.softmax(s, axis=-1)
        ctx = jnp.einsum("bhqk,bhkd->bhqd", p.astype(jnp.bfloat16), v.astype(jnp.bfloat16),
                         preferred_element_type=jnp.float32)
        ctx = ctx.transpose(0, 2, 1, 3).reshape(B * S, D)
        y = ln(mm(ctx, wo) + bo + hf, g1, be1)
        ff = mm(jnp.maximum(mm(y, w1) + b1, 0.0), w2) + b2
        h = ln(ff + y, g2, be2).reshape(B, S, D)
    return h


if __name__ == "__main__":
    # Small shapes consistent with Encoder(num_head=4, d_model=32, d_ff=64, N=2).
    B, S, D, H, F, N = 2, 8, 32, 4, 64, 2

    key = jax.random.PRNGKey(0)
    kx, kp = jax.random.split(key)
    x = jax.random.normal(kx, (B, S, D), dtype=jnp.float32)

    params = stack_layers(init_layer_params(kp, D, F), N)

    # b_tile=1 exercises the leading "parallel" batch-tile axis (v7x megacore).
    enc_out, pad_mask = encoder_forward(x, params, num_head=H, b_tile=1)
    jax.block_until_ready(enc_out)
    jax.block_until_ready(pad_mask)

    assert enc_out.shape == (B, S, D)
    assert pad_mask.shape == (B, 1, S, D)

    # Correctness vs pure-JAX reference (same bf16 matmul precision as the kernel).
    ref = encoder_reference(x, params, num_head=H)
    err = float(jnp.max(jnp.abs(enc_out - ref)))
    assert err < 2e-2, f"max abs error vs reference: {err}"
    print("KERNEL_OK")
</pallas_src>

<mosaic_0001>
module attributes {stable_mosaic.version = 11 : i64} {
  func.func @encoder_layer_kernel(%arg0: i32, %arg1: i32, %arg2: memref<1x8x32xf32, #tpu.memory_space<vmem>>, %arg3: memref<1x1x8xf32, #tpu.memory_space<vmem>>, %arg4: memref<1x3x32x32xbf16, #tpu.memory_space<vmem>>, %arg5: memref<1x32x32xbf16, #tpu.memory_space<vmem>>, %arg6: memref<1x32x64xbf16, #tpu.memory_space<vmem>>, %arg7: memref<1x64x32xbf16, #tpu.memory_space<vmem>>, %arg8: memref<1x10x64xf32, #tpu.memory_space<vmem>>, %arg9: memref<1x8x32xf32, #tpu.memory_space<vmem>>) attributes {dimension_semantics = [#tpu.dimension_semantics<parallel>, #tpu.dimension_semantics<arbitrary>], iteration_bounds = array<i64: 2, 2>, scalar_prefetch = 0 : i64, scratch_operands = 0 : i64, tpu.core_type = #tpu.core_type<tc>, window_params = [{transform_indices = @transform_0, window_bounds = array<i64: 1, 8, 32>}, {transform_indices = @transform_1, window_bounds = array<i64: 1, 1, 8>}, {transform_indices = @transform_2, window_bounds = array<i64: 1, 3, 32, 32>}, {transform_indices = @transform_3, window_bounds = array<i64: 1, 32, 32>}, {transform_indices = @transform_4, window_bounds = array<i64: 1, 32, 64>}, {transform_indices = @transform_5, window_bounds = array<i64: 1, 64, 32>}, {transform_indices = @transform_6, window_bounds = array<i64: 1, 10, 64>}, {transform_indices = @transform_7, window_bounds = array<i64: 1, 8, 32>}]} {
    %c0_i32 = arith.constant 0 : i32
    %0 = arith.cmpi eq, %arg1, %c0_i32 : i32
    %1 = arith.extui %0 : i1 to i32
    %c0_i32_0 = arith.constant 0 : i32
    %2 = arith.cmpi ne, %1, %c0_i32_0 : i32
    scf.if %2 {
      %c0_65 = arith.constant 0 : index
      %c0_66 = arith.constant 0 : index
      %c0_67 = arith.constant 0 : index
      %213 = vector.load %arg2[%c0_65, %c0_66, %c0_67] : memref<1x8x32xf32, #tpu.memory_space<vmem>>, vector<1x8x32xf32>
      %c0_68 = arith.constant 0 : index
      %c0_69 = arith.constant 0 : index
      %c0_70 = arith.constant 0 : index
      %214 = vector.load %arg9[%c0_68, %c0_69, %c0_70] : memref<1x8x32xf32, #tpu.memory_space<vmem>>, vector<1x8x32xf32>
      tpu.vector_store %arg9[%c0_68, %c0_69, %c0_70], %213 {strides = array<i32>} : memref<1x8x32xf32, #tpu.memory_space<vmem>>, vector<1x8x32xf32>,
    } else {
    }
    %c0 = arith.constant 0 : index
    %c0_1 = arith.constant 0 : index
    %c0_2 = arith.constant 0 : index
    %3 = vector.load %arg9[%c0, %c0_1, %c0_2] : memref<1x8x32xf32, #tpu.memory_space<vmem>>, vector<1x8x32xf32>
    %4 = vector.shape_cast %3 : vector<1x8x32xf32> to vector<8x32xf32>
    %5 = arith.truncf %4 : vector<8x32xf32> to vector<8x32xbf16>
    %c0_3 = arith.constant 0 : index
    %c0_4 = arith.constant 0 : index
    %c0_5 = arith.constant 0 : index
    %6 = vector.load %arg8[%c0_3, %c0_4, %c0_5] : memref<1x10x64xf32, #tpu.memory_space<vmem>>, vector<1x10x64xf32>
    %7 = vector.shape_cast %6 : vector<1x10x64xf32> to vector<10x64xf32>
    %8 = vector.extract_strided_slice %7 {offsets = [0, 0], sizes = [1, 32], strides = [1, 1]} : vector<10x64xf32> to vector<1x32xf32>
    %9 = vector.extract_strided_slice %7 {offsets = [1, 0], sizes = [1, 32], strides = [1, 1]} : vector<10x64xf32> to vector<1x32xf32>
    %10 = vector.extract_strided_slice %7 {offsets = [2, 0], sizes = [1, 32], strides = [1, 1]} : vector<10x64xf32> to vector<1x32xf32>
    %11 = vector.extract_strided_slice %7 {offsets = [3, 0], sizes = [1, 32], strides = [1, 1]} : vector<10x64xf32> to vector<1x32xf32>
    %12 = vector.extract_strided_slice %7 {offsets = [4, 0], sizes = [1, 32], strides = [1, 1]} : vector<10x64xf32> to vector<1x32xf32>
    %13 = vector.extract_strided_slice %7 {offsets = [5, 0], sizes = [1, 32], strides = [1, 1]} : vector<10x64xf32> to vector<1x32xf32>
    %14 = vector.extract_strided_slice %7 {offsets = [6, 0], sizes = [1, 32], strides = [1, 1]} : vector<10x64xf32> to vector<1x32xf32>
    %15 = vector.extract_strided_slice %7 {offsets = [7, 0], sizes = [1, 32], strides = [1, 1]} : vector<10x64xf32> to vector<1x32xf32>
    %16 = vector.extract_strided_slice %7 {offsets = [8, 0], sizes = [1, 32], strides = [1, 1]} : vector<10x64xf32> to vector<1x32xf32>
    %17 = vector.extract_strided_slice %7 {offsets = [9, 0], sizes = [1, 64], strides = [1, 1]} : vector<10x64xf32> to vector<1x64xf32>
    %c0_6 = arith.constant 0 : index
    %c0_7 = arith.constant 0 : index
    %c0_8 = arith.constant 0 : index
    %c0_9 = arith.constant 0 : index
    %18 = vector.load %arg4[%c0_6, %c0_7, %c0_8, %c0_9] : memref<1x3x32x32xbf16, #tpu.memory_space<vmem>>, vector<1x3x32x32xbf16>
    %19 = vector.shape_cast %18 : vector<1x3x32x32xbf16> to vector<3x32x32xbf16>
    %20 = vector.extract_strided_slice %19 {offsets = [0, 0, 0], sizes = [1, 32, 32], strides = [1, 1, 1]} : vector<3x32x32xbf16> to vector<1x32x32xbf16>
    %21 = vector.shape_cast %20 : vector<1x32x32xbf16> to vector<32x32xbf16>
    %cst = arith.constant dense<0.000000e+00> : vector<8x32xf32>
    %22 = tpu.matmul %5, %21, %cst {dimension_numbers = #tpu.dot_dimension_numbers<[1], [0], [0], [1], [0, 0, 1, 1], [], []>} : vector<8x32xbf16>, vector<32x32xbf16>, vector<8x32xf32> -> vector<8x32xf32>
    %23 = vector.broadcast %8 : vector<1x32xf32> to vector<8x32xf32>
    %24 = arith.addf %22, %23 : vector<8x32xf32>
    %25 = vector.extract_strided_slice %19 {offsets = [1, 0, 0], sizes = [1, 32, 32], strides = [1, 1, 1]} : vector<3x32x32xbf16> to vector<1x32x32xbf16>
    %26 = vector.shape_cast %25 : vector<1x32x32xbf16> to vector<32x32xbf16>
    %cst_10 = arith.constant dense<0.000000e+00> : vector<8x32xf32>
    %27 = tpu.matmul %5, %26, %cst_10 {dimension_numbers = #tpu.dot_dimension_numbers<[1], [0], [0], [1], [0, 0, 1, 1], [], []>} : vector<8x32xbf16>, vector<32x32xbf16>, vector<8x32xf32> -> vector<8x32xf32>
    %28 = vector.broadcast %9 : vector<1x32xf32> to vector<8x32xf32>
    %29 = arith.addf %27, %28 : vector<8x32xf32>
    %30 = vector.extract_strided_slice %19 {offsets = [2, 0, 0], sizes = [1, 32, 32], strides = [1, 1, 1]} : vector<3x32x32xbf16> to vector<1x32x32xbf16>
    %31 = vector.shape_cast %30 : vector<1x32x32xbf16> to vector<32x32xbf16>
    %cst_11 = arith.constant dense<0.000000e+00> : vector<8x32xf32>
    %32 = tpu.matmul %5, %31, %cst_11 {dimension_numbers = #tpu.dot_dimension_numbers<[1], [0], [0], [1], [0, 0, 1, 1], [], []>} : vector<8x32xbf16>, vector<32x32xbf16>, vector<8x32xf32> -> vector<8x32xf32>
    %33 = vector.broadcast %10 : vector<1x32xf32> to vector<8x32xf32>
    %34 = arith.addf %32, %33 : vector<8x32xf32>
    %35 = vector.shape_cast %24 : vector<8x32xf32> to vector<1x8x32xf32>
    %36 = arith.truncf %35 : vector<1x8x32xf32> to vector<1x8x32xbf16>
    %37 = vector.shape_cast %29 : vector<8x32xf32> to vector<1x8x32xf32>
    %38 = arith.truncf %37 : vector<1x8x32xf32> to vector<1x8x32xbf16>
    %39 = vector.shape_cast %34 : vector<8x32xf32> to vector<1x8x32xf32>
    %40 = arith.truncf %39 : vector<1x8x32xf32> to vector<1x8x32xbf16>
    %c0_12 = arith.constant 0 : index
    %c0_13 = arith.constant 0 : index
    %c0_14 = arith.constant 0 : index
    %41 = vector.load %arg3[%c0_12, %c0_13, %c0_14] : memref<1x1x8xf32, #tpu.memory_space<vmem>>, vector<1x1x8xf32>
    %c0_15 = arith.constant 0 : index
    %c0_16 = arith.constant 0 : index
    %c0_17 = arith.constant 0 : index
    %42 = vector.load %arg5[%c0_15, %c0_16, %c0_17] : memref<1x32x32xbf16, #tpu.memory_space<vmem>>, vector<1x32x32xbf16>
    %43 = vector.shape_cast %42 : vector<1x32x32xbf16> to vector<32x32xbf16>
    %cst_18 = arith.constant 0.000000e+00 : f32
    %44 = vector.broadcast %cst_18 : f32 to vector<8x32xf32>
    %45 = vector.extract_strided_slice %36 {offsets = [0, 0, 0], sizes = [1, 8, 8], strides = [1, 1, 1]} : vector<1x8x32xbf16> to vector<1x8x8xbf16>
    %46 = vector.extract_strided_slice %38 {offsets = [0, 0, 0], sizes = [1, 8, 8], strides = [1, 1, 1]} : vector<1x8x32xbf16> to vector<1x8x8xbf16>
    %47 = vector.extract_strided_slice %40 {offsets = [0, 0, 0], sizes = [1, 8, 8], strides = [1, 1, 1]} : vector<1x8x32xbf16> to vector<1x8x8xbf16>
    %cst_19 = arith.constant dense<0.000000e+00> : vector<1x8x8xf32>
    %48 = tpu.matmul %45, %46, %cst_19 {dimension_numbers = #tpu.dot_dimension_numbers<[2], [2], [1], [1], [0, 0, 0, 1, 1, 1], [0], [0]>} : vector<1x8x8xbf16>, vector<1x8x8xbf16>, vector<1x8x8xf32> -> vector<1x8x8xf32>
    %cst_20 = arith.constant 0.353553385 : f32
    %49 = vector.broadcast %cst_20 : f32 to vector<1x8x8xf32>
    %50 = arith.mulf %48, %49 : vector<1x8x8xf32>
    %51 = vector.broadcast %41 : vector<1x1x8xf32> to vector<1x8x8xf32>
    %52 = arith.addf %50, %51 : vector<1x8x8xf32>
    %cst_21 = arith.constant dense<0xFF800000> : vector<1x8xf32>
    %53 = vector.multi_reduction <maximumf>, %52, %cst_21 [2] : vector<1x8x8xf32> to vector<1x8xf32>
    %54 = vector.shape_cast %53 : vector<1x8xf32> to vector<1x8x1xf32>
    %55 = vector.broadcast %54 : vector<1x8x1xf32> to vector<1x8x8xf32>
    %56 = arith.subf %52, %55 : vector<1x8x8xf32>
    %57 = math.exp %56 : vector<1x8x8xf32>
    %cst_22 = arith.constant dense<0.000000e+00> : vector<1x8xf32>
    %58 = vector.multi_reduction <add>, %57, %cst_22 [2] : vector<1x8x8xf32> to vector<1x8xf32>
    %59 = vector.shape_cast %58 : vector<1x8xf32> to vector<1x8x1xf32>
    %60 = tpu.reciprocal %59 : vector<1x8x1xf32> -> vector<1x8x1xf32>
    %61 = vector.broadcast %60 : vector<1x8x1xf32> to vector<1x8x8xf32>
    %62 = arith.mulf %57, %61 : vector<1x8x8xf32>
    %63 = arith.truncf %62 : vector<1x8x8xf32> to vector<1x8x8xbf16>
    %cst_23 = arith.constant dense<0.000000e+00> : vector<1x8x8xf32>
    %64 = tpu.matmul %63, %47, %cst_23 {dimension_numbers = #tpu.dot_dimension_numbers<[2], [1], [1], [2], [0, 0, 0, 1, 1, 2], [0], [0]>} : vector<1x8x8xbf16>, vector<1x8x8xbf16>, vector<1x8x8xf32> -> vector<1x8x8xf32>
    %65 = vector.shape_cast %64 : vector<1x8x8xf32> to vector<8x8xf32>
    %66 = arith.truncf %65 : vector<8x8xf32> to vector<8x8xbf16>
    %67 = vector.extract_strided_slice %43 {offsets = [0, 0], sizes = [8, 32], strides = [1, 1]} : vector<32x32xbf16> to vector<8x32xbf16>
    %cst_24 = arith.constant dense<0.000000e+00> : vector<8x32xf32>
    %68 = tpu.matmul %66, %67, %cst_24 {dimension_numbers = #tpu.dot_dimension_numbers<[1], [0], [0], [1], [0, 0, 1, 1], [], []>} : vector<8x8xbf16>, vector<8x32xbf16>, vector<8x32xf32> -> vector<8x32xf32>
    %69 = arith.addf %44, %68 : vector<8x32xf32>
    %70 = vector.extract_strided_slice %36 {offsets = [0, 0, 8], sizes = [1, 8, 8], strides = [1, 1, 1]} : vector<1x8x32xbf16> to vector<1x8x8xbf16>
    %71 = vector.extract_strided_slice %38 {offsets = [0, 0, 8], sizes = [1, 8, 8], strides = [1, 1, 1]} : vector<1x8x32xbf16> to vector<1x8x8xbf16>
    %72 = vector.extract_strided_slice %40 {offsets = [0, 0, 8], sizes = [1, 8, 8], strides = [1, 1, 1]} : vector<1x8x32xbf16> to vector<1x8x8xbf16>
    %cst_25 = arith.constant dense<0.000000e+00> : vector<1x8x8xf32>
    %73 = tpu.matmul %70, %71, %cst_25 {dimension_numbers = #tpu.dot_dimension_numbers<[2], [2], [1], [1], [0, 0, 0, 1, 1, 1], [0], [0]>} : vector<1x8x8xbf16>, vector<1x8x8xbf16>, vector<1x8x8xf32> -> vector<1x8x8xf32>
    %cst_26 = arith.constant 0.353553385 : f32
    %74 = vector.broadcast %cst_26 : f32 to vector<1x8x8xf32>
    %75 = arith.mulf %73, %74 : vector<1x8x8xf32>
    %76 = vector.broadcast %41 : vector<1x1x8xf32> to vector<1x8x8xf32>
    %77 = arith.addf %75, %76 : vector<1x8x8xf32>
    %cst_27 = arith.constant dense<0xFF800000> : vector<1x8xf32>
    %78 = vector.multi_reduction <maximumf>, %77, %cst_27 [2] : vector<1x8x8xf32> to vector<1x8xf32>
    %79 = vector.shape_cast %78 : vector<1x8xf32> to vector<1x8x1xf32>
    %80 = vector.broadcast %79 : vector<1x8x1xf32> to vector<1x8x8xf32>
    %81 = arith.subf %77, %80 : vector<1x8x8xf32>
    %82 = math.exp %81 : vector<1x8x8xf32>
    %cst_28 = arith.constant dense<0.000000e+00> : vector<1x8xf32>
    %83 = vector.multi_reduction <add>, %82, %cst_28 [2] : vector<1x8x8xf32> to vector<1x8xf32>
    %84 = vector.shape_cast %83 : vector<1x8xf32> to vector<1x8x1xf32>
    %85 = tpu.reciprocal %84 : vector<1x8x1xf32> -> vector<1x8x1xf32>
    %86 = vector.broadcast %85 : vector<1x8x1xf32> to vector<1x8x8xf32>
    %87 = arith.mulf %82, %86 : vector<1x8x8xf32>
    %88 = arith.truncf %87 : vector<1x8x8xf32> to vector<1x8x8xbf16>
    %cst_29 = arith.constant dense<0.000000e+00> : vector<1x8x8xf32>
    %89 = tpu.matmul %88, %72, %cst_29 {dimension_numbers = #tpu.dot_dimension_numbers<[2], [1], [1], [2], [0, 0, 0, 1, 1, 2], [0], [0]>} : vector<1x8x8xbf16>, vector<1x8x8xbf16>, vector<1x8x8xf32> -> vector<1x8x8xf32>
    %90 = vector.shape_cast %89 : vector<1x8x8xf32> to vector<8x8xf32>
    %91 = arith.truncf %90 : vector<8x8xf32> to vector<8x8xbf16>
    %92 = vector.extract_strided_slice %43 {offsets = [8, 0], sizes = [8, 32], strides = [1, 1]} : vector<32x32xbf16> to vector<8x32xbf16>
    %cst_30 = arith.constant dense<0.000000e+00> : vector<8x32xf32>
    %93 = tpu.matmul %91, %92, %cst_30 {dimension_numbers = #tpu.dot_dimension_numbers<[1], [0], [0], [1], [0, 0, 1, 1], [], []>} : vector<8x8xbf16>, vector<8x32xbf16>, vector<8x32xf32> -> vector<8x32xf32>
    %94 = arith.addf %69, %93 : vector<8x32xf32>
    %95 = vector.extract_strided_slice %36 {offsets = [0, 0, 16], sizes = [1, 8, 8], strides = [1, 1, 1]} : vector<1x8x32xbf16> to vector<1x8x8xbf16>
    %96 = vector.extract_strided_slice %38 {offsets = [0, 0, 16], sizes = [1, 8, 8], strides = [1, 1, 1]} : vector<1x8x32xbf16> to vector<1x8x8xbf16>
    %97 = vector.extract_strided_slice %40 {offsets = [0, 0, 16], sizes = [1, 8, 8], strides = [1, 1, 1]} : vector<1x8x32xbf16> to vector<1x8x8xbf16>
    %cst_31 = arith.constant dense<0.000000e+00> : vector<1x8x8xf32>
    %98 = tpu.matmul %95, %96, %cst_31 {dimension_numbers = #tpu.dot_dimension_numbers<[2], [2], [1], [1], [0, 0, 0, 1, 1, 1], [0], [0]>} : vector<1x8x8xbf16>, vector<1x8x8xbf16>, vector<1x8x8xf32> -> vector<1x8x8xf32>
    %cst_32 = arith.constant 0.353553385 : f32
    %99 = vector.broadcast %cst_32 : f32 to vector<1x8x8xf32>
    %100 = arith.mulf %98, %99 : vector<1x8x8xf32>
    %101 = vector.broadcast %41 : vector<1x1x8xf32> to vector<1x8x8xf32>
    %102 = arith.addf %100, %101 : vector<1x8x8xf32>
    %cst_33 = arith.constant dense<0xFF800000> : vector<1x8xf32>
    %103 = vector.multi_reduction <maximumf>, %102, %cst_33 [2] : vector<1x8x8xf32> to vector<1x8xf32>
    %104 = vector.shape_cast %103 : vector<1x8xf32> to vector<1x8x1xf32>
    %105 = vector.broadcast %104 : vector<1x8x1xf32> to vector<1x8x8xf32>
    %106 = arith.subf %102, %105 : vector<1x8x8xf32>
    %107 = math.exp %106 : vector<1x8x8xf32>
    %cst_34 = arith.constant dense<0.000000e+00> : vector<1x8xf32>
    %108 = vector.multi_reduction <add>, %107, %cst_34 [2] : vector<1x8x8xf32> to vector<1x8xf32>
    %109 = vector.shape_cast %108 : vector<1x8xf32> to vector<1x8x1xf32>
    %110 = tpu.reciprocal %109 : vector<1x8x1xf32> -> vector<1x8x1xf32>
    %111 = vector.broadcast %110 : vector<1x8x1xf32> to vector<1x8x8xf32>
    %112 = arith.mulf %107, %111 : vector<1x8x8xf32>
    %113 = arith.truncf %112 : vector<1x8x8xf32> to vector<1x8x8xbf16>
    %cst_35 = arith.constant dense<0.000000e+00> : vector<1x8x8xf32>
    %114 = tpu.matmul %113, %97, %cst_35 {dimension_numbers = #tpu.dot_dimension_numbers<[2], [1], [1], [2], [0, 0, 0, 1, 1, 2], [0], [0]>} : vector<1x8x8xbf16>, vector<1x8x8xbf16>, vector<1x8x8xf32> -> vector<1x8x8xf32>
    %115 = vector.shape_cast %114 : vector<1x8x8xf32> to vector<8x8xf32>
    %116 = arith.truncf %115 : vector<8x8xf32> to vector<8x8xbf16>
    %117 = vector.extract_strided_slice %43 {offsets = [16, 0], sizes = [8, 32], strides = [1, 1]} : vector<32x32xbf16> to vector<8x32xbf16>
    %cst_36 = arith.constant dense<0.000000e+00> : vector<8x32xf32>
    %118 = tpu.matmul %116, %117, %cst_36 {dimension_numbers = #tpu.dot_dimension_numbers<[1], [0], [0], [1], [0, 0, 1, 1], [], []>} : vector<8x8xbf16>, vector<8x32xbf16>, vector<8x32xf32> -> vector<8x32xf32>
    %119 = arith.addf %94, %118 : vector<8x32xf32>
    %120 = vector.extract_strided_slice %36 {offsets = [0, 0, 24], sizes = [1, 8, 8], strides = [1, 1, 1]} : vector<1x8x32xbf16> to vector<1x8x8xbf16>
    %121 = vector.extract_strided_slice %38 {offsets = [0, 0, 24], sizes = [1, 8, 8], strides = [1, 1, 1]} : vector<1x8x32xbf16> to vector<1x8x8xbf16>
    %122 = vector.extract_strided_slice %40 {offsets = [0, 0, 24], sizes = [1, 8, 8], strides = [1, 1, 1]} : vector<1x8x32xbf16> to vector<1x8x8xbf16>
    %cst_37 = arith.constant dense<0.000000e+00> : vector<1x8x8xf32>
    %123 = tpu.matmul %120, %121, %cst_37 {dimension_numbers = #tpu.dot_dimension_numbers<[2], [2], [1], [1], [0, 0, 0, 1, 1, 1], [0], [0]>} : vector<1x8x8xbf16>, vector<1x8x8xbf16>, vector<1x8x8xf32> -> vector<1x8x8xf32>
    %cst_38 = arith.constant 0.353553385 : f32
    %124 = vector.broadcast %cst_38 : f32 to vector<1x8x8xf32>
    %125 = arith.mulf %123, %124 : vector<1x8x8xf32>
    %126 = vector.broadcast %41 : vector<1x1x8xf32> to vector<1x8x8xf32>
    %127 = arith.addf %125, %126 : vector<1x8x8xf32>
    %cst_39 = arith.constant dense<0xFF800000> : vector<1x8xf32>
    %128 = vector.multi_reduction <maximumf>, %127, %cst_39 [2] : vector<1x8x8xf32> to vector<1x8xf32>
    %129 = vector.shape_cast %128 : vector<1x8xf32> to vector<1x8x1xf32>
    %130 = vector.broadcast %129 : vector<1x8x1xf32> to vector<1x8x8xf32>
    %131 = arith.subf %127, %130 : vector<1x8x8xf32>
    %132 = math.exp %131 : vector<1x8x8xf32>
    %cst_40 = arith.constant dense<0.000000e+00> : vector<1x8xf32>
    %133 = vector.multi_reduction <add>, %132, %cst_40 [2] : vector<1x8x8xf32> to vector<1x8xf32>
    %134 = vector.shape_cast %133 : vector<1x8xf32> to vector<1x8x1xf32>
    %135 = tpu.reciprocal %134 : vector<1x8x1xf32> -> vector<1x8x1xf32>
    %136 = vector.broadcast %135 : vector<1x8x1xf32> to vector<1x8x8xf32>
    %137 = arith.mulf %132, %136 : vector<1x8x8xf32>
    %138 = arith.truncf %137 : vector<1x8x8xf32> to vector<1x8x8xbf16>
    %cst_41 = arith.constant dense<0.000000e+00> : vector<1x8x8xf32>
    %139 = tpu.matmul %138, %122, %cst_41 {dimension_numbers = #tpu.dot_dimension_numbers<[2], [1], [1], [2], [0, 0, 0, 1, 1, 2], [0], [0]>} : vector<1x8x8xbf16>, vector<1x8x8xbf16>, vector<1x8x8xf32> -> vector<1x8x8xf32>
    %140 = vector.shape_cast %139 : vector<1x8x8xf32> to vector<8x8xf32>
    %141 = arith.truncf %140 : vector<8x8xf32> to vector<8x8xbf16>
    %142 = vector.extract_strided_slice %43 {offsets = [24, 0], sizes = [8, 32], strides = [1, 1]} : vector<32x32xbf16> to vector<8x32xbf16>
    %cst_42 = arith.constant dense<0.000000e+00> : vector<8x32xf32>
    %143 = tpu.matmul %141, %142, %cst_42 {dimension_numbers = #tpu.dot_dimension_numbers<[1], [0], [0], [1], [0, 0, 1, 1], [], []>} : vector<8x8xbf16>, vector<8x32xbf16>, vector<8x32xf32> -> vector<8x32xf32>
    %144 = arith.addf %119, %143 : vector<8x32xf32>
    %145 = vector.broadcast %11 : vector<1x32xf32> to vector<8x32xf32>
    %146 = arith.addf %144, %145 : vector<8x32xf32>
    %147 = arith.addf %146, %4 : vector<8x32xf32>
    %cst_43 = arith.constant dense<0.000000e+00> : vector<8xf32>
    %148 = vector.multi_reduction <add>, %147, %cst_43 [1] : vector<8x32xf32> to vector<8xf32>
    %149 = vector.shape_cast %148 : vector<8xf32> to vector<8x1xf32>
    %cst_44 = arith.constant 3.200000e+01 : f32
    %150 = vector.broadcast %cst_44 : f32 to vector<8x1xf32>
    %151 = arith.divf %149, %150 : vector<8x1xf32>
    %152 = vector.broadcast %151 : vector<8x1xf32> to vector<8x32xf32>
    %153 = arith.subf %147, %152 : vector<8x32xf32>
    %154 = vector.broadcast %151 : vector<8x1xf32> to vector<8x32xf32>
    %155 = arith.subf %147, %154 : vector<8x32xf32>
    %156 = arith.mulf %153, %155 : vector<8x32xf32>
    %cst_45 = arith.constant dense<0.000000e+00> : vector<8xf32>
    %157 = vector.multi_reduction <add>, %156, %cst_45 [1] : vector<8x32xf32> to vector<8xf32>
    %158 = vector.shape_cast %157 : vector<8xf32> to vector<8x1xf32>
    %cst_46 = arith.constant 3.200000e+01 : f32
    %159 = vector.broadcast %cst_46 : f32 to vector<8x1xf32>
    %160 = arith.divf %158, %159 : vector<8x1xf32>
    %161 = vector.broadcast %151 : vector<8x1xf32> to vector<8x32xf32>
    %162 = arith.subf %147, %161 : vector<8x32xf32>
    %cst_47 = arith.constant 9.99999974E-6 : f32
    %163 = vector.broadcast %cst_47 : f32 to vector<8x1xf32>
    %164 = arith.addf %160, %163 : vector<8x1xf32>
    %165 = math.rsqrt %164 : vector<8x1xf32>
    %166 = vector.broadcast %165 : vector<8x1xf32> to vector<8x32xf32>
    %167 = arith.mulf %162, %166 : vector<8x32xf32>
    %168 = vector.broadcast %12 : vector<1x32xf32> to vector<8x32xf32>
    %169 = arith.mulf %167, %168 : vector<8x32xf32>
    %170 = vector.broadcast %13 : vector<1x32xf32> to vector<8x32xf32>
    %171 = arith.addf %169, %170 : vector<8x32xf32>
    %172 = arith.truncf %171 : vector<8x32xf32> to vector<8x32xbf16>
    %c0_48 = arith.constant 0 : index
    %c0_49 = arith.constant 0 : index
    %c0_50 = arith.constant 0 : index
    %173 = vector.load %arg6[%c0_48, %c0_49, %c0_50] : memref<1x32x64xbf16, #tpu.memory_space<vmem>>, vector<1x32x64xbf16>
    %174 = vector.shape_cast %173 : vector<1x32x64xbf16> to vector<32x64xbf16>
    %cst_51 = arith.constant dense<0.000000e+00> : vector<8x64xf32>
    %175 = tpu.matmul %172, %174, %cst_51 {dimension_numbers = #tpu.dot_dimension_numbers<[1], [0], [0], [1], [0, 0, 1, 1], [], []>} : vector<8x32xbf16>, vector<32x64xbf16>, vector<8x64xf32> -> vector<8x64xf32>
    %176 = vector.broadcast %17 : vector<1x64xf32> to vector<8x64xf32>
    %177 = arith.addf %175, %176 : vector<8x64xf32>
    %cst_52 = arith.constant 0.000000e+00 : f32
    %178 = vector.broadcast %cst_52 : f32 to vector<8x64xf32>
    %179 = arith.maximumf %177, %178 : vector<8x64xf32>
    %180 = arith.truncf %179 : vector<8x64xf32> to vector<8x64xbf16>
    %c0_53 = arith.constant 0 : index
    %c0_54 = arith.constant 0 : index
    %c0_55 = arith.constant 0 : index
    %181 = vector.load %arg7[%c0_53, %c0_54, %c0_55] : memref<1x64x32xbf16, #tpu.memory_space<vmem>>, vector<1x64x32xbf16>
    %182 = vector.shape_cast %181 : vector<1x64x32xbf16> to vector<64x32xbf16>
    %cst_56 = arith.constant dense<0.000000e+00> : vector<8x32xf32>
    %183 = tpu.matmul %180, %182, %cst_56 {dimension_numbers = #tpu.dot_dimension_numbers<[1], [0], [0], [1], [0, 0, 1, 1], [], []>} : vector<8x64xbf16>, vector<64x32xbf16>, vector<8x32xf32> -> vector<8x32xf32>
    %184 = vector.broadcast %14 : vector<1x32xf32> to vector<8x32xf32>
    %185 = arith.addf %183, %184 : vector<8x32xf32>
    %186 = arith.addf %185, %171 : vector<8x32xf32>
    %cst_57 = arith.constant dense<0.000000e+00> : vector<8xf32>
    %187 = vector.multi_reduction <add>, %186, %cst_57 [1] : vector<8x32xf32> to vector<8xf32>
    %188 = vector.shape_cast %187 : vector<8xf32> to vector<8x1xf32>
    %cst_58 = arith.constant 3.200000e+01 : f32
    %189 = vector.broadcast %cst_58 : f32 to vector<8x1xf32>
    %190 = arith.divf %188, %189 : vector<8x1xf32>
    %191 = vector.broadcast %190 : vector<8x1xf32> to vector<8x32xf32>
    %192 = arith.subf %186, %191 : vector<8x32xf32>
    %193 = vector.broadcast %190 : vector<8x1xf32> to vector<8x32xf32>
    %194 = arith.subf %186, %193 : vector<8x32xf32>
    %195 = arith.mulf %192, %194 : vector<8x32xf32>
    %cst_59 = arith.constant dense<0.000000e+00> : vector<8xf32>
    %196 = vector.multi_reduction <add>, %195, %cst_59 [1] : vector<8x32xf32> to vector<8xf32>
    %197 = vector.shape_cast %196 : vector<8xf32> to vector<8x1xf32>
    %cst_60 = arith.constant 3.200000e+01 : f32
    %198 = vector.broadcast %cst_60 : f32 to vector<8x1xf32>
    %199 = arith.divf %197, %198 : vector<8x1xf32>
    %200 = vector.broadcast %190 : vector<8x1xf32> to vector<8x32xf32>
    %201 = arith.subf %186, %200 : vector<8x32xf32>
    %cst_61 = arith.constant 9.99999974E-6 : f32
    %202 = vector.broadcast %cst_61 : f32 to vector<8x1xf32>
    %203 = arith.addf %199, %202 : vector<8x1xf32>
    %204 = math.rsqrt %203 : vector<8x1xf32>
    %205 = vector.broadcast %204 : vector<8x1xf32> to vector<8x32xf32>
    %206 = arith.mulf %201, %205 : vector<8x32xf32>
    %207 = vector.broadcast %15 : vector<1x32xf32> to vector<8x32xf32>
    %208 = arith.mulf %206, %207 : vector<8x32xf32>
    %209 = vector.broadcast %16 : vector<1x32xf32> to vector<8x32xf32>
    %210 = arith.addf %208, %209 : vector<8x32xf32>
    %211 = vector.shape_cast %210 : vector<8x32xf32> to vector<1x8x32xf32>
    %c0_62 = arith.constant 0 : index
    %c0_63 = arith.constant 0 : index
    %c0_64 = arith.constant 0 : index
    %212 = vector.load %arg9[%c0_62, %c0_63, %c0_64] : memref<1x8x32xf32, #tpu.memory_space<vmem>>, vector<1x8x32xf32>
    tpu.vector_store %arg9[%c0_62, %c0_63, %c0_64], %211 {strides = array<i32>} : memref<1x8x32xf32, #tpu.memory_space<vmem>>, vector<1x8x32xf32>,
    return
  }
  func.func @transform_0(%arg0: i32, %arg1: i32) -> (i32, i32, i32) {
    %c0_i32 = arith.constant 0 : i32
    %c0_i32_0 = arith.constant 0 : i32
    %c0_i32_1 = arith.constant 0 : i32
    return %arg0, %c0_i32, %c0_i32_0 : i32, i32, i32
  }
  func.func @transform_1(%arg0: i32, %arg1: i32) -> (i32, i32, i32) {
    %c0_i32 = arith.constant 0 : i32
    %c0_i32_0 = arith.constant 0 : i32
    %c0_i32_1 = arith.constant 0 : i32
    return %arg0, %c0_i32, %c0_i32_0 : i32, i32, i32
  }
  func.func @transform_2(%arg0: i32, %arg1: i32) -> (i32, i32, i32, i32) {
    %c0_i32 = arith.constant 0 : i32
    %c0_i32_0 = arith.constant 0 : i32
    %c0_i32_1 = arith.constant 0 : i32
    %c0_i32_2 = arith.constant 0 : i32
    return %arg1, %c0_i32, %c0_i32_0, %c0_i32_1 : i32, i32, i32, i32
  }
  func.func @transform_3(%arg0: i32, %arg1: i32) -> (i32, i32, i32) {
    %c0_i32 = arith.constant 0 : i32
    %c0_i32_0 = arith.constant 0 : i32
    %c0_i32_1 = arith.constant 0 : i32
    return %arg1, %c0_i32, %c0_i32_0 : i32, i32, i32
  }
  func.func @transform_4(%arg0: i32, %arg1: i32) -> (i32, i32, i32) {
    %c0_i32 = arith.constant 0 : i32
    %c0_i32_0 = arith.constant 0 : i32
    %c0_i32_1 = arith.constant 0 : i32
    return %arg1, %c0_i32, %c0_i32_0 : i32, i32, i32
  }
  func.func @transform_5(%arg0: i32, %arg1: i32) -> (i32, i32, i32) {
    %c0_i32 = arith.constant 0 : i32
    %c0_i32_0 = arith.constant 0 : i32
    %c0_i32_1 = arith.constant 0 : i32
    return %arg1, %c0_i32, %c0_i32_0 : i32, i32, i32
  }
  func.func @transform_6(%arg0: i32, %arg1: i32) -> (i32, i32, i32) {
    %c0_i32 = arith.constant 0 : i32
    %c0_i32_0 = arith.constant 0 : i32
    %c0_i32_1 = arith.constant 0 : i32
    return %arg1, %c0_i32, %c0_i32_0 : i32, i32, i32
  }
  func.func @transform_7(%arg0: i32, %arg1: i32) -> (i32, i32, i32) {
    %c0_i32 = arith.constant 0 : i32
    %c0_i32_0 = arith.constant 0 : i32
    %c0_i32_1 = arith.constant 0 : i32
    return %arg0, %c0_i32, %c0_i32_0 : i32, i32, i32
  }
}

</mosaic_0001>

<bundles_post_ra>
// kernel: tpu_custom_call.1
= control target key start
LH: loop header
LB: loop body
LE: loop exit
PB: predicated region body
PF: predicated region fallthrough
CT: control target
= control target key end

     0   :  { %s2776_s0 = inlined_call_operand.hbm [shape: f32[2,8,32], index: 0, kind: input, shape index: {}]   ;;  %s2777_s1 = inlined_call_operand.vmem [shape: f32[2,1,8], index: 1, kind: input, shape index: {}]   ;;  %s2778_s2 = inlined_call_operand.vmem [shape: bf16[2,3,32,32], index: 2, kind: input, shape index: {}]   ;;  %s2779_s3 = inlined_call_operand.hbm [shape: bf16[2,32,32], index: 3, kind: input, shape index: {}]   ;;  %s2780_s4 = inlined_call_operand.vmem [shape: bf16[2,32,64], index: 4, kind: input, shape index: {}]   ;;  %s2781_s5 = inlined_call_operand.vmem [shape: bf16[2,64,32], index: 5, kind: input, shape index: {}]   ;;  %s2782_s6 = inlined_call_operand.vmem [shape: f32[2,10,64], index: 6, kind: input, shape index: {}]   ;;  %s2783_s7 = inlined_call_operand.hbm [shape: f32[2,8,32], index: 7, kind: output, shape index: {}]  }
   0x1   :  { %2800 = sst [smem:[#allocation23_spill]] %s2776_s0 }
   0x2   :  { %2801 = sst [smem:[#allocation24_spill]] %s2779_s3 }
   0x3   :  { %2802 = sst [smem:[#allocation25_spill]] %s2783_s7 }
   0x4   :  { %12 = vsyncpa [#allocation3], 0 }
   0x5   :  { %14 = vsyncpa [#allocation3 + $0x1], 0 }
   0x6   :  { %15 = vsyncpa [#allocation6], 0 }
   0x7   :  { %17 = vsyncpa [#allocation6 + $0x1], 0 }
   0x8   :  { %18 = vsyncpa [#allocation4], 0 }
   0x9   :  { %20 = vsyncpa [#allocation4 + $0x1], 0  ;;  %s2264_s24 = smov 0   ;;  %s2266_s25 = smov 0  }
   0xa   :  { %s2268_s26 = smov 0   ;;  %s2270_s27 = smov 0  }
   0xb   :  { %s2272_s28 = smov 0   ;;  %s2274_s29 = smov 0  }
   0xc   :  { %s2276_s30 = smov 0   ;;  %s2278_s8 = smov 0  }
   0xd   :  { %s2280_s9 = smov 0   ;;  %s2282_s10 = smov 0  }
   0xe   :  { %s2284_s11 = smov 0  }
   0xf LB: > { %2803 = sst [smem:[#allocation11_spill]] %s2184_s27  ;;  %s1663_s12 = sadd.s32 4294967295, %s2212_s11   ;;  %s2212_s11 = sphi %s2284_s11, %s26_s11   ;;  %s2208_s10 = sphi %s2282_s10, %s2847_s10   ;;  %s2204_s9 = sphi %s2280_s9, %s2846_s9   ;;  %s2200_s8 = sphi %s2278_s8, %s2845_s8   ;;  %s2196_s30 = sphi %s2276_s30, %s2844_s30   ;;  %s2192_s29 = sphi %s2274_s29, %s2843_s29   ;;  %s2188_s28 = sphi %s2272_s28, %s2851_s28   ;;  %s2184_s27 = sphi %s2270_s27, %s2841_s27   ;;  %s2180_s26 = sphi %s2268_s26, %s2850_s26   ;;  %s2176_s25 = sphi %s2266_s25, %s2849_s25   ;;  %s2172_s24 = sphi %s2264_s24, %s2848_s24  }
  0x10   : > { %2804 = sst [smem:[#allocation12_spill]] %s2188_s28  ;;  %s1664_s13 = sadd.s32 4294967294, %s2212_s11  }
  0x11   : > { %2805 = sst [smem:[#allocation13_spill]] %s2192_s29  ;;  %p52_p0 = scmp.ne.s32.totalorder %s2192_s29, %s2188_s28 }
  0x12   : > { %2806 = sst [smem:[#allocation14_spill]] %s2204_s9  ;;  %p53_p1 = scmp.eq.s32.totalorder %s2212_s11, 0 }
  0x13   : > { %2807 = sst [smem:[#allocation15_spill]] %s2208_s10  ;;  %p58_p2 = scmp.ne.s32.totalorder %s2188_s28, %s2184_s27 }
  0x14   : > { %2808 = sst [smem:[#allocation16_spill]] %s2212_s11  ;;  %p59_p3 = scmp.eq.s32.totalorder %s1663_s12, 0 }
  0x15   : > { %p2326_p4 = por %p53_p1, %p52_p0  ;;  %p130_p5 = scmp.ne.s32.totalorder %s2180_s26, %s2176_s25 }
  0x16   : > { %p2332_p6 = por %p59_p3, %p58_p2  ;;  %p136_p7 = scmp.ne.s32.totalorder %s2176_s25, %s2172_s24 }
  0x17   : > { %p2337_p8 = por %p130_p5, %p53_p1  ;;  %p238_p9 = scmp.eq.s32.totalorder %s1663_s12, 3 }
  0x18   : > { %s2810_s17 = scalar_select %p2332_p6, 1, 0 }
  0x19   : > { %p2341_p10 = por %p136_p7, %p59_p3  ;;  %p244_p11 = scmp.eq.s32.totalorder %s1664_s13, 3 }
  0x1a   : > { %p2345_p12 = por %p238_p9, %p52_p0  ;;  %p1897_p1 = scmp.lt.s32.totalorder %s2212_s11, 4 }
  0x1b   : > { %s2812_s19 = scalar_select %p2341_p10, 1, 0 }
  0x1c   : > { %s2813_s20 = scalar_select %p2345_p12, 1, 0 }
  0x1d   : > { %p2349_p13 = por %p244_p11, %p58_p2  ;;  %s264_s22 = sand.u32 1, %s2192_s29  }
  0x1e   : > { %2814 = sst [smem:[#allocation17_spill]] %s2813_s20  ;;  %s1668_s23 = sshll.u32 %s2208_s10, 7 }
  0x1f   : > { %s2815_s21 = scalar_select %p2349_p13, 1, 0 }
  0x20   : > { %s1667_s24 = sshll.u32 %s264_s22, 3  ;;  %s2817_s0 = sld [smem:[#allocation23_spill]] }
  0x21   : > { %2816 = sst [smem:[#allocation18_spill]] %s2815_s21  ;;  %s268_s13 = scalar_lea.vmem [#allocation2], %s1667_s24 }
  0x22   : > { %s275_s27 = sshll.u32 %s268_s13, 4  ;;  %p2363_p0 = pnand %p1897_p1, %p2326_p4  ;;  %s2367_s27 = int_to_ptr.vmem [resolvable:$true] %s275_s27 }
  0x23   : > { %p2371_p2 = pnand %p1897_p1, %p2337_p8  ;;  %s265_s15 = scalar_lea.sflag [#allocation3], %s264_s22 }
  0x24   : > { %p2028_p7 = pneg %p2363_p0 }
  0x26   : > { %s2359_s12 = scalar_lea.hbm %s2817_s0, %s1668_s23  ;;  %s2031_s13 = scalar_lea.hbm %s2817_s0, 256 }
  0x27   : > { %s2026_s23 = scalar_lea.hbm %s2359_s12, 128  ;;  %p2032_p8 = scmp.lt.u32.totalorder %s2359_s12, %s2817_s0 }
  0x28   : > { %p2027_p5 = scmp.ne.s32.totalorder %s2359_s12, %s2026_s23  ;;  %p2033_p11 = scmp.lt.u32.totalorder %s2031_s13, %s2026_s23 }
  0x29   : > { %p2035_p3 = scmp.lt.u32.totalorder %s2026_s23, %s2359_s12 }
  0x2a   : > { %p2029_p4 = pnand %p2028_p7, %p2027_p5  ;;  %p2034_p1 = por %p2033_p11, %p2032_p8 }
  0x2c   : > { %p2030_p9 = pneg %p2029_p4  ;;  %p2036_p13 = por %p2035_p3, %p2034_p1 }
  0x2e   : > { %p2037_p12 = pnand %p2036_p13, %p2030_p9 }
  0x30   : > { %2040 = shalt.err (!%p2037_p12)
}
  0x31   : > { %s2041_s22 = scalar_lea.vmem %s2367_s27, 128  ;;  %s2214_s16 = smov [#allocation2]  }
  0x32   : > { %p2042_p5 = scmp.ne.s32.totalorder %s2367_s27, %s2041_s22  ;;  %s2046_s24 = sshll.u32 %s2214_s16, 4  ;;  %s2047_s24 = int_to_ptr.vmem [resolvable:$false] %s2046_s24 }
  0x33   : > { %s2048_s21 = scalar_lea.vmem %s2047_s24, 256  ;;  %p2049_p6 = scmp.lt.s32.totalorder %s2367_s27, %s2047_s24 }
  0x34   : > { %p2044_p4 = pnand %p2042_p5, %p2028_p7  ;;  %p2050_p8 = scmp.lt.s32.totalorder %s2048_s21, %s2041_s22 }
  0x36   : > { %p2045_p10 = pneg %p2044_p4  ;;  %p2051_p11 = por %p2050_p8, %p2049_p6 }
  0x38   : > { %p2052_p3 = pnand %p2051_p11, %p2045_p10 }
  0x3a   : > { %2055 = shalt.err (!%p2052_p3)
}
  0x3b   : > { %1889 = dma.hbm_to_vmem [thread:$0]  (!%p2363_p0), %s2359_s12, 128, %s2367_s27, %s265_s15  }
  0x3c   : > { %p339_p12 = scmp.lt.s32.totalorder %s2212_s11, 5  ;;  %s123_s23 = sadd.s32 1, %s2180_s26 }
  0x3d   : > { %p2820_p13 = scmp.ge.s32.totalorder %s2212_s11, 1  ;;  %s35_s7 = sadd.s32 1, %s2204_s9 }
  0x3e   : > { %s296_s18 = sand.u32 1, %s2180_s26   ;;  %p36_p10 = scmp.ge.s32.totalorder %s35_s7, 2 }
  0x3f   : > { %p2405_p6 = pnand %p2820_p13, %p339_p12  ;;  %s1669_s22 = sshll.u32 %s296_s18, 4 }
  0x40   : > { %s1718_s16 = sshll.u32 %s2204_s9, 8  ;;  %s2853_s7 = smov (%p36_p10, %s35_s7), 0 }
  0x41   : > { %2822 = sst [smem:[#allocation19_spill]] %s2853_s7  ;;  %s2823_s24 = sadd.s32 1, %s2208_s10 }
  0x42   : > { %s2855_s24 = smov (!%p36_p10, %s2823_s24), %s2208_s10  ;;  %s120_s27 = ssub.s32 %s2204_s9, %s2853_s7 }
  0x43   : > { %p40_p0 = scmp.ge.s32.totalorder %s2855_s24, 2  ;;  %p121_p7 = scmp.eq.s32.totalorder %s120_s27, 0 }
  0x44   : > { %s2824_s3 = sld [smem:[#allocation24_spill]]  ;;  %s300_s0 = scalar_lea.vmem [#allocation5], %s1669_s22 }
  0x45   : > { %s307_s11 = sshll.u32 %s300_s0, 4  ;;  %s2857_s24 = smov (%p40_p0, %s2855_s24), 0  ;;  %s2431_s11 = int_to_ptr.vmem [resolvable:$true] %s307_s11 }
  0x46   : > { %2825 = sst [smem:[#allocation20_spill]] %s2857_s24  ;;  %s42_s7 = ssub.s32 %s2208_s10, %s2857_s24 }
  0x47   : > { %s2427_s20 = scalar_select %p121_p7, %s2180_s26, %s123_s23  }
  0x48   : > { %p43_p9 = scmp.eq.s32.totalorder %s42_s7, 0  ;;  %s2827_s27 = sadd.s32 1, %s2192_s29 }
  0x49   : > { %2826 = sst [smem:[#allocation21_spill]] %s2427_s20  ;;  %p2058_p5 = pneg %p2371_p2 }
  0x4a   : > { %s2422_s21 = scalar_lea.hbm %s2824_s3, %s1718_s16  ;;  %s2438_s16 = scalar_lea.sflag [#allocation6], %s296_s18 }
  0x4b   : > { %s2436_s9 = scalar_select %p43_p9, %s2192_s29, %s2827_s27  }
  0x4c   : > { %s2056_s12 = scalar_lea.hbm %s2422_s21, 256  ;;  %s2061_s22 = scalar_lea.hbm %s2824_s3, 512 }
  0x4d   : > { %2828 = sst [smem:[#allocation22_spill]] %s2436_s9  ;;  %p2057_p1 = scmp.ne.s32.totalorder %s2422_s21, %s2056_s12 }
  0x4e   : > { %p2062_p11 = scmp.lt.u32.totalorder %s2422_s21, %s2824_s3  ;;  %p2063_p3 = scmp.lt.u32.totalorder %s2061_s22, %s2056_s12 }
  0x4f   : > { %p2059_p4 = pnand %p2058_p5, %p2057_p1  ;;  %p2065_p13 = scmp.lt.u32.totalorder %s2056_s12, %s2422_s21 }
  0x50   : > { %p2064_p12 = por %p2063_p3, %p2062_p11 }
  0x51   : > { %p2060_p8 = pneg %p2059_p4 }
  0x52   : > { %p2066_p10 = por %p2065_p13, %p2064_p12 }
  0x54   : > { %p2067_p0 = pnand %p2066_p10, %p2060_p8 }
  0x56   : > { %2070 = shalt.err (!%p2067_p0)
}
  0x57   : > { %s2071_s7 = scalar_lea.vmem %s2431_s11, 256  ;;  %s2215_s18 = smov [#allocation5]  }
  0x58   : > { %p2072_p7 = scmp.ne.s32.totalorder %s2431_s11, %s2071_s7  ;;  %s2076_s27 = sshll.u32 %s2215_s18, 4  ;;  %s2077_s27 = int_to_ptr.vmem [resolvable:$false] %s2076_s27 }
  0x59   : > { %s2078_s24 = scalar_lea.vmem %s2077_s27, 512  ;;  %p2079_p4 = scmp.lt.s32.totalorder %s2431_s11, %s2077_s27 }
  0x5a   : > { %p2074_p9 = pnand %p2072_p7, %p2058_p5  ;;  %p2080_p11 = scmp.lt.s32.totalorder %s2078_s24, %s2071_s7 }
  0x5c   : > { %p2075_p1 = pneg %p2074_p9  ;;  %p2081_p3 = por %p2080_p11, %p2079_p4 }
  0x5e   : > { %p2082_p12 = pnand %p2081_p3, %p2075_p1 }
  0x60   : > { %2085 = shalt.err (!%p2082_p12)
}
  0x61   : > { %s2216_s12 = smov 64   ;;  %s2217_s0 = smov 4  }
  0x62   : > { %1892 = dma.hbm_to_vmem [thread:$0]  (!%p2371_p2), %s2422_s21, 256, %s2431_s11, %s2438_s16, %s2216_s12, %s2216_s12, %s2217_s0  }
  0x63   : > { %343 = sbr.rel (%p2405_p6) target bundleno = 3812 (0xee4), region = 48  ;;  %s2469_s23 = sand.u32 (!%p2405_p6), 1, %s2188_s28  }
  0x64   : > { %s1673_s22 = sshll.u32 (!%p2405_p6), %s2469_s23, 3  ;;  %s346_s15 = scalar_lea.sflag (!%p2405_p6), [#allocation3], %s2469_s23 }
  0x65   : > { %s349_s7 = scalar_lea.vmem (!%p2405_p6), [#allocation2], %s1673_s22  ;;  %p2829_p5 = scmp.ne.s32.totalorder (!%p2405_p6), %s2810_s17, 0 }
  0x6a   : > { %2159 = dma.done.wait (%p2829_p5), %s346_s15, 128  }
  0x6b   : > { %2161 = vsyncadd (%p2829_p5), %s346_s15, 4294967168  ;;  %s354_s11 = sand.u32 1, %s2176_s25   ;;  %p2830_p2 = scmp.ne.s32.totalorder %s2812_s19, 0 }
  0x6c   : > { %s1674_s14 = sshll.u32 %s354_s11, 4  ;;  %s355_s13 = scalar_lea.sflag [#allocation6], %s354_s11 }
  0x6d   : > { %s2478_s21 = scalar_lea.vmem [#allocation5], %s1674_s14 }
  0x6e   : > { %2163 = dma.done.wait (%p2830_p2), %s355_s13, 256  }
  0x6f   : > { %2165 = vsyncadd (%p2830_p2), %s355_s13, 4294967040  ;;  %p417_p6 = scmp.lt.s32.totalorder %s2200_s8, 1  ;;  %p420_p8 = scmp.lt.s32.totalorder %s2196_s30, 1 }
  0x70   : > { %s2514_s20 = scalar_lea.vmem [#allocation7], %s1673_s22  ;;  %p1683_p13 = scmp.ne.s32.totalorder %s2196_s30, 0 }
  0x71   : > { %s2487_s17 = scalar_select %p417_p6, %s2200_s8, 1 }
  0x72   : > { %s421_s16 = scalar_select %p420_p8, %s2196_s30, 1 }
  0x73   : > { %444 = sbr.rel (%p1683_p13) target bundleno = 122 (0x7a), region = 60  ;;  %v445_v0 = vld [vmem:[%s349_s7] sm:$0xff] (!%p1683_p13)  ;;  %vm446_vm0 = vcmask (!%p1683_p13), 261120  }
  0x74   : > { %s1879_s12 = smul.u32 48, %s421_s16  ;;  %s1719_s0 = sshll.u32 %s421_s16, 4  ;;  %447 = vst.msk [vmem:[%s2514_s20] sm:$0xff] (!%p1683_p13), %vm446_vm0, %v445_v0 }
  0x75   : > { %s2497_s19 = scalar_lea.vmem %s2780_s4, %s1719_s0  ;;  %s1720_s14 = sshll.u32 %s421_s16, 5 }
  0x76   : > { %s2502_s10 = scalar_lea.vmem %s2778_s2, %s1879_s12  ;;  %s2507_s28 = scalar_lea.vmem %s2781_s5, %s1720_s14 }
  0x77   : > { %s2512_s24 = scalar_lea.vmem %s2782_s6, %s1719_s0 }
  0x7a PF: > { %v1994_v1 = vld [vmem:[%s2502_s10] sm:$0xff]   ;;  %v2218_v2 = vmov 0.0   ;;  %v1995_v3 = vld [vmem:[%s2502_s10 + $0x8] sm:$0xff]   ;;  %vm2219_vm1 = vmmov 0   ;;  %vm480_vm2 = vcmask 261120   ;;  %v1996_v6 = vld [vmem:[%s2502_s10 + $0x10] sm:$0xff]   ;;  %v464_v8 = vlaneseq  ;;  %s2831_s9 = scalar_lea.vmem %s2777_s1, %s2487_s17 }
  0x7b   : > { %1763 = vmatprep.subr.bf16.mxu1 %v2218_v2  ;;  %1779 = vmatprep.subr.bf16.mxu0 %v2218_v2  ;;  %v2525_v4 = vld [vmem:[%s2514_s20] sm:$0xff]  ;;  %v2548_v16 = vld [vmem:[%s2512_s24] sm:$0xff]  ;;  %vm644_vm3 = vcmask 64512   ;;  %s2220_s3 = smov 120   ;;  %v1999_v29 = vld [vmem:[%s2502_s10 + $0x28] sm:$0xff]   ;;  %vm714_vm4 = vcmask 1043456  }
  0x7c   : > { %1764 = vmatpush3.bf16.msra.mxu1 %v1994_v1  ;;  %1767 = vmatprep.mubr.msk.bf16.mxu1 %vm2219_vm1, %v2218_v2  ;;  %v449_v5 = vpack.c.bf16 %v2525_v4, %v2525_v4  ;;  %v1997_v7 = vld [vmem:[%s2502_s10 + $0x18] sm:$0xff]   ;;  %v2543_v9 = vshrl.u32 %v464_v8, 7  ;;  %v1998_v28 = vld [vmem:[%s2502_s10 + $0x20] sm:$0xff]   ;;  %s2221_s10 = smov 112   ;;  %s2222_s22 = smov 104   ;;  %vm1419_vm5 = vcmask 523264  }
  0x7d   : > { %1765 = vmatprep.subr.bf16.mxu1 %v2218_v2  ;;  %1783 = vmatprep.mubr.msk.bf16.mxu0 %vm2219_vm1, %v2218_v2  ;;  %v2588_v34 = vld [vmem:[%s2831_s9] ss:$0 sm:$0xff]  ;;  %s1715_s7 = sshll.u32 %s2200_s8, 7  ;;  %s1489_s15 = scalar_lea.sflag [#allocation4], %s2469_s23 }
  0x7e   : > { %v526_v12 = vsub.s32 1, %v2543_v9  ;;  %v466_v14 = vsub.s32 0, %v2543_v9  ;;  %1780 = vmatpush3.bf16.msra.mxu0 %v1998_v28  ;;  %v582_v57 = vsub.s32 2, %v2543_v9  ;;  %s2223_s8 = smov [#allocation7]  }
  0x7f   : > { %1781 = vmatprep.subr.bf16.mxu0 %v2218_v2 }
  0x80   : > { %1766 = vmatpush3.bf16.msra.mxu1 %v1995_v3  ;;  %v527_v17 = vrot.slane %v2548_v16, %v526_v12  ;;  %v467_v18 = vrot.slane %v2548_v16, %v466_v14  ;;  %v583_v58 = vrot.slane %v2548_v16, %v582_v57 }
  0x81   : > { %1771 = vmatprep.subr.bf16.mxu1 %v2218_v2 }
  0x82   : > { %1782 = vmatpush3.bf16.msra.mxu0 %v1999_v29 }
  0x83   : > { %1768 = vmatmul.mubr.msk.bf16.vlgmr.msra.gmra.mrb[0].mxu1 %vm480_vm2, %v449_v5  ;;  %1793 = vmatprep.subr.bf16.mxu0 %v2218_v2 }
  0x84   : > { %1772 = vmatpush3.bf16.msra.mxu1 %v1996_v6  ;;  %1775 = vmatprep.mubr.msk.bf16.mxu1 %vm2219_vm1, %v2218_v2 }
  0x85   : > { %1773 = vmatprep.subr.bf16.mxu1 %v2218_v2  ;;  %1784 = vmatmul.mubr.msk.bf16.vlgmr.msra.gmra.mrb[0].mxu0 %vm480_vm2, %v449_v5 }
  0x86   : > { %1795 = vmatprep.mubr.msk.bf16.mxu0 %vm2219_vm1, %v2218_v2 }
  0x88   : > { %1774 = vmatpush3.bf16.msra.mxu1 %v1997_v7 }
  0x89   : > { %1787 = vmatprep.subr.bf16.mxu1 %v2218_v2 }
  0x8b   : > { %1776 = vmatmul.mubr.msk.bf16.vlgmr.msra.gmra.mrb[4].mxu1 %vm480_vm2, %v449_v5 }
  0x8c   : > { %1789 = vmatprep.mubr.msk.bf16.mxu1 %vm2219_vm1, %v2218_v2 }
 0x156   : > { %v518_v10 = vpop.f32.mrb[0].mxu1 }
 0x157   : > { %v1769_v11 = vpop.f32.mrb[1].mxu1  ;;  %v519_v23 = vadd.f32 %v518_v10, %v467_v18  ;;  %v641_v10 = vld [vmem:[%s2478_s21 + $0x4] sm:$0xf] }
 0x158   : > { %v521_v13 = vpop.f32.mrb[2].mxu1  ;;  %v630_v51 = vpop.f32.mrb[0].mxu0  ;;  %v879_v11 = vsel %vm714_vm4, %v641_v10, 0 }
 0x159   : > { %v1770_v15 = vpop.f32.mrb[3].mxu1  ;;  %v2562_v27 = vpack.c.bf16 %v519_v23, %v519_v23  ;;  %v1785_v52 = vpop.f32.mrb[1].mxu0  ;;  %v631_v59 = vadd.f32 %v630_v51, %v583_v58 }
 0x15a   : > { %v633_v53 = vpop.f32.mrb[2].mxu0 }
 0x15b   : > { %v1786_v54 = vpop.f32.mrb[3].mxu0  ;;  %v2597_v60 = vpack.c.bf16 %v631_v59, %v631_v59 }
 0x15d   : > { %v716_v61 = vsel %vm714_vm4, %v2597_v60, 0 }
 0x15e   : > { %v574_v19 = vpop.f32.mrb[4].mxu1  ;;  %1794 = vmatpush3.bf16.msra.mxu0 %v716_v61 }
 0x15f   : > { %v575_v20 = vadd.f32 %v574_v19, %v527_v17  ;;  %v1777_v21 = vpop.f32.mrb[5].mxu1  ;;  %1805 = vmatprep.subr.bf16.mxu0 %v2218_v2  ;;  %v640_v19 = vld [vmem:[%s2478_s21] sm:$0xf] }
 0x160   : > { %v577_v22 = vpop.f32.mrb[6].mxu1 }
 0x161   : > { %v2556_v24 = vpack.c.bf16 %v575_v20, %v575_v20  ;;  %v1778_v25 = vpop.f32.mrb[7].mxu1  ;;  %v925_v22 = vsel %vm714_vm4, %v640_v19, 0 }
 0x163   : > { %763 = vrot.lane.b32.xlu0 %v2556_v24, %s2220_s3  ;;  %v649_v26 = vsel %vm644_vm3, %v2556_v24, 0 }
 0x164   : > { %1788 = vmatpush3.bf16.xpose.msra.mxu1 %v649_v26 }
 0x165   : > { %1799 = vmatprep.subr.bf16.mxu1 %v2218_v2 }
 0x167   : > { %760 = vrot.lane.b32.xlu0 %v2562_v27, %s2220_s3 }
 0x16b   : > { %1790 = vmatmul.mubr.msk.bf16.vlgmr.msra.gmra.mrb[8].mxu1 %vm644_vm3, %v2562_v27 }
 0x16c   : > { %1801 = vmatprep.mubr.msk.bf16.mxu1 %vm2219_vm1, %v2218_v2 }
 0x1d5   : > { %v764_v30 = vpop.permute.xlu0 %763 }
 0x1d6   : > { %v769_v31 = vsel %vm644_vm3, %v764_v30, 0 }
 0x1d7   : > { %1800 = vmatpush3.bf16.xpose.msra.mxu1 %v769_v31 }
 0x1d8   : > { %1811 = vmatprep.subr.bf16.mxu1 %v2218_v2 }
 0x1d9   : > { %v761_v32 = vpop.permute.xlu0 %760 }
 0x1de   : > { %1802 = vmatmul.mubr.msk.bf16.vlgmr.msra.gmra.mrb[12].mxu1 %vm644_vm3, %v761_v32 }
 0x1df   : > { %1813 = vmatprep.mubr.msk.bf16.mxu1 %vm2219_vm1, %v2218_v2  ;;  %1812 = vmatpush3.bf16.msra.mxu1 %v879_v11 }
 0x1e0   : > { %1823 = vmatprep.subr.bf16.mxu1 %v2218_v2 }
 0x23e   : > { %v685_v33 = vpop.f32.mrb[8].mxu1 }
 0x23f   : > { %v691_v35 = vmul.f32 0.35355338, %v685_v33  ;;  %v1791_v36 = vpop.f32.mrb[9].mxu1 }
 0x240   : > { %v688_v37 = vpop.f32.mrb[10].mxu1 }
 0x241   : > { %v1792_v38 = vpop.f32.mrb[11].mxu1  ;;  %v698_v39 = vadd.f32 %v2588_v34, %v691_v35 }
 0x243   : > { %v699_v40 = vsel %vm644_vm3, %v698_v39, -inf }
 0x244   : > { %700 = vmax.xlane.f32.xlu1 %v699_v40 }
 0x2b1   : > { %v805_v41 = vpop.f32.mrb[12].mxu1 }
 0x2b2   : > { %v811_v42 = vmul.f32 0.35355338, %v805_v41  ;;  %v1803_v43 = vpop.f32.mrb[13].mxu1 }
 0x2b3   : > { %v808_v44 = vpop.f32.mrb[14].mxu1 }
 0x2b4   : > { %v1804_v45 = vpop.f32.mrb[15].mxu1  ;;  %v812_v46 = vadd.f32 %v2588_v34, %v811_v42 }
 0x2b6   : > { %v813_v47 = vsel %vm644_vm3, %v812_v46, -inf }
 0x2b7   : > { %814 = vmax.xlane.f32.xlu1 %v813_v47 }
 0x2d1   : > { %v701_v48 = vpop.xlane.xlu1 %700 }
 0x2d2   : > { %v702_v49 = vsub.f32 %v698_v39, %v701_v48 }
 0x2d4   : > { %v703_v50 = vmul.f32 1.442695, %v702_v49 }
 0x2d6   : > { %2006 = vpow2.f32 %v703_v50 }
 0x2e0   : > { %v2007_v55 = vpop.eup %2006 }
 0x2e1   : > { %v705_v56 = vsel %vm644_vm3, %v2007_v55, 0.0 }
 0x2e2   : > { %706 = vadd.xlane.f32.xlu0 %v705_v56 }
 0x2f8   : > { %1031 = vrot.lane.b32.xlu0 %v2597_v60, %s2221_s10 }
 0x344   : > { %v815_v62 = vpop.xlane.xlu1 %814 }
 0x345   : > { %v816_v63 = vsub.f32 %v812_v46, %v815_v62 }
 0x347   : > { %v817_v0 = vmul.f32 1.442695, %v816_v63 }
 0x349   : > { %2008 = vpow2.f32 %v817_v0 }
 0x353   : > { %v2009_v1 = vpop.eup %2008 }
 0x354   : > { %v819_v3 = vsel %vm644_vm3, %v2009_v1, 0.0 }
 0x355   : > { %820 = vadd.xlane.f32.xlu1 %v819_v3 }
 0x366   : > { %826 = vrot.lane.b32.xlu1 %v2597_v60, %s2220_s3 }
 0x36a   : > { %969 = vrot.lane.b32.xlu1 %v2556_v24, %s2221_s10 }
 0x36e   : > { %967 = vrot.lane.b32.xlu1 %v2562_v27, %s2221_s10 }
 0x36f   : > { %v707_v5 = vpop.xlane.xlu0 %706 }
 0x370   : > { %2010 = vrcp.f32 %v707_v5 }
 0x373   : > { %v1032_v23 = vpop.permute.xlu0 %1031 }
 0x374   : > { %v1037_v30 = vsel %vm714_vm4, %v1032_v23, 0 }
 0x37a   : > { %v2011_v6 = vpop.eup %2010 }
 0x37b   : > { %v709_v7 = vmul.f32 %v2011_v6, %v2007_v55 }
 0x37d   : > { %v710_v8 = vpack.c.bf16 %v709_v7, %v709_v7 }
 0x37f   : > { %1796 = vmatmul.mubr.msk.bf16.vlgmr.msra.gmra.mrb[4].mxu0 %vm644_vm3, %v710_v8 }
 0x380   : > { %1807 = vmatprep.mubr.msk.bf16.mxu0 %vm2219_vm1, %v2218_v2 }
 0x3e2   : > { %v821_v13 = vpop.xlane.xlu1 %820 }
 0x3e3   : > { %2012 = vrcp.f32 %v821_v13 }
 0x3e6   : > { %v827_v15 = vpop.permute.xlu1 %826 }
 0x3e7   : > { %v832_v17 = vsel %vm714_vm4, %v827_v15, 0 }
 0x3e8   : > { %1806 = vmatpush3.bf16.msra.mxu0 %v832_v17 }
 0x3e9   : > { %1817 = vmatprep.subr.bf16.mxu0 %v2218_v2 }
 0x3ea   : > { %v970_v32 = vpop.permute.xlu1 %969 }
 0x3eb   : > { %v975_v38 = vsel %vm644_vm3, %v970_v32, 0 }
 0x3ed   : > { %v2013_v18 = vpop.eup %2012 }
 0x3ee   : > { %v823_v20 = vmul.f32 %v2013_v18, %v2009_v1  ;;  %v968_v40 = vpop.permute.xlu1 %967 }
 0x3f0   : > { %v824_v21 = vpack.c.bf16 %v823_v20, %v823_v20 }
 0x3f2   : > { %1808 = vmatmul.mubr.msk.bf16.vlgmr.msra.gmra.mrb[8].mxu0 %vm644_vm3, %v824_v21 }
 0x3f3   : > { %1818 = vmatpush3.bf16.msra.mxu0 %v925_v22  ;;  %1819 = vmatprep.mubr.msk.bf16.mxu0 %vm2219_vm1, %v2218_v2 }
 0x3f4   : > { %1829 = vmatprep.subr.bf16.mxu0 %v2218_v2 }
 0x452   : > { %v752_v25 = vpop.f32.mrb[4].mxu0 }
 0x453   : > { %v758_v26 = vpack.c.bf16 %v752_v25, %v752_v25  ;;  %v1797_v28 = vpop.f32.mrb[5].mxu0 }
 0x454   : > { %v755_v29 = vpop.f32.mrb[6].mxu0 }
 0x455   : > { %v1798_v31 = vpop.f32.mrb[7].mxu0  ;;  %1820 = vmatmul.mubr.msk.bf16.vlgmr.msra.gmra.mrb[12].mxu0 %vm644_vm3, %v758_v26 }
 0x456   : > { %1830 = vmatpush3.bf16.msra.mxu0 %v1037_v30  ;;  %1831 = vmatprep.mubr.msk.bf16.mxu0 %vm2219_vm1, %v2218_v2  ;;  %v643_v31 = vld [vmem:[%s2478_s21 + $0xc] sm:$0xf] }
 0x457   : > { %1841 = vmatprep.subr.bf16.mxu0 %v2218_v2  ;;  %v1244_v32 = vsel %vm714_vm4, %v643_v31, 0 }
 0x4c5   : > { %v868_v33 = vpop.f32.mrb[8].mxu0 }
 0x4c6   : > { %v874_v35 = vpack.c.bf16 %v868_v33, %v868_v33  ;;  %v1809_v36 = vpop.f32.mrb[9].mxu0 }
 0x4c7   : > { %v871_v37 = vpop.f32.mrb[10].mxu0 }
 0x4c8   : > { %v1810_v39 = vpop.f32.mrb[11].mxu0  ;;  %1814 = vmatmul.mubr.msk.bf16.vlgmr.msra.gmra.mrb[16].mxu1 %vm644_vm3, %v874_v35 }
 0x4c9   : > { %1824 = vmatpush3.bf16.xpose.msra.mxu1 %v975_v38  ;;  %1825 = vmatprep.mubr.msk.bf16.mxu1 %vm2219_vm1, %v2218_v2 }
 0x4ca   : > { %1835 = vmatprep.subr.bf16.mxu1 %v2218_v2 }
 0x4d0   : > { %1826 = vmatmul.mubr.msk.bf16.vlgmr.msra.gmra.mrb[20].mxu1 %vm644_vm3, %v968_v40 }
 0x4d1   : > { %1837 = vmatprep.mubr.msk.bf16.mxu1 %vm2219_vm1, %v2218_v2 }
 0x528   : > { %v961_v41 = vpop.f32.mrb[12].mxu0 }
 0x529   : > { %v1821_v42 = vpop.f32.mrb[13].mxu0 }
 0x52a   : > { %v964_v43 = vpop.f32.mrb[14].mxu0 }
 0x52b   : > { %v1822_v44 = vpop.f32.mrb[15].mxu0 }
 0x59b   : > { %v915_v45 = vpop.f32.mrb[16].mxu1 }
 0x59c   : > { %v2635_v46 = vadd.f32 %v961_v41, %v915_v45  ;;  %v1815_v47 = vpop.f32.mrb[17].mxu1 }
 0x59d   : > { %v918_v48 = vpop.f32.mrb[18].mxu1 }
 0x59e   : > { %v1816_v49 = vpop.f32.mrb[19].mxu1  ;;  %v1289_v48 = vsub.s32 3, %v2543_v9 }
 0x5a0   : > { %v1290_v49 = vrot.slane %v2548_v16, %v1289_v48 }
 0x5a3   : > { %v1011_v50 = vpop.f32.mrb[20].mxu1 }
 0x5a4   : > { %v1017_v51 = vmul.f32 0.35355338, %v1011_v50  ;;  %v1827_v52 = vpop.f32.mrb[21].mxu1 }
 0x5a5   : > { %v1014_v53 = vpop.f32.mrb[22].mxu1 }
 0x5a6   : > { %v1828_v54 = vpop.f32.mrb[23].mxu1  ;;  %v1018_v55 = vadd.f32 %v2588_v34, %v1017_v51 }
 0x5a8   : > { %v1019_v56 = vsel %vm644_vm3, %v1018_v55, -inf }
 0x5a9   : > { %1020 = vmax.xlane.f32.xlu1 %v1019_v56 }
 0x636   : > { %v1021_v57 = vpop.xlane.xlu1 %1020 }
 0x637   : > { %v1022_v58 = vsub.f32 %v1018_v55, %v1021_v57 }
 0x639   : > { %v1023_v59 = vmul.f32 1.442695, %v1022_v58 }
 0x63b   : > { %2014 = vpow2.f32 %v1023_v59 }
 0x645   : > { %v2015_v61 = vpop.eup %2014 }
 0x646   : > { %v1025_v62 = vsel %vm644_vm3, %v2015_v61, 0.0 }
 0x647   : > { %1026 = vadd.xlane.f32.xlu0 %v1025_v62 }
 0x65d   : > { %1129 = vrot.lane.b32.xlu0 %v2556_v24, %s2222_s22 }
 0x661   : > { %1127 = vrot.lane.b32.xlu0 %v2562_v27, %s2222_s22  ;;  %v642_v27 = vld [vmem:[%s2478_s21 + $0x8] sm:$0xf]  ;;  %s1502_s21 = sshll.u32 %s2514_s20, 4  ;;  %s2713_s21 = int_to_ptr.vmem [resolvable:$true] %s1502_s21 }
 0x662   : > { %v1084_v7 = vsel %vm714_vm4, %v642_v27, 0  ;;  %v1309_v27 = vsub.s32 4, %v2543_v9  ;;  %s2086_s11 = scalar_lea.vmem %s2713_s21, 128 }
 0x663   : > { %1836 = vmatpush3.bf16.msra.mxu1 %v1084_v7  ;;  %v1314_v7 = vsub.s32 5, %v2543_v9  ;;  %p2087_p10 = scmp.ne.s32.totalorder %s2713_s21, %s2086_s11 }
 0x664   : > { %1847 = vmatprep.subr.bf16.mxu1 %v2218_v2 }
 0x6d4   : > { %v1027_v63 = vpop.xlane.xlu0 %1026 }
 0x6d5   : > { %2016 = vrcp.f32 %v1027_v63 }
 0x6d8   : > { %v1130_v3 = vpop.permute.xlu0 %1129 }
 0x6d9   : > { %v1135_v6 = vsel %vm644_vm3, %v1130_v3, 0  ;;  %v2002_v3 = vld [vmem:[%s2507_s28] sm:$0xff]  }
 0x6dc   : > { %v1128_v24 = vpop.permute.xlu0 %1127 }
 0x6df   : > { %v2017_v0 = vpop.eup %2016 }
 0x6e0   : > { %v1029_v1 = vmul.f32 %v2017_v0, %v2015_v61  ;;  %v2000_v0 = vld [vmem:[%s2497_s19] sm:$0xff]  }
 0x6e2   : > { %v1030_v5 = vpack.c.bf16 %v1029_v1, %v1029_v1  ;;  %v2001_v1 = vld [vmem:[%s2497_s19 + $0x8] sm:$0xff]   ;;  %s2090_s19 = sshll.u32 %s2223_s8, 4  ;;  %s2091_s19 = int_to_ptr.vmem [resolvable:$false] %s2090_s19 }
 0x6e3   : > { %s2092_s14 = scalar_lea.vmem %s2091_s19, 256  ;;  %p2093_p1 = scmp.lt.s32.totalorder %s2713_s21, %s2091_s19 }
 0x6e4   : > { %1832 = vmatmul.mubr.msk.bf16.vlgmr.msra.gmra.mrb[16].mxu0 %vm644_vm3, %v1030_v5  ;;  %p2094_p4 = scmp.lt.s32.totalorder %s2092_s14, %s2086_s11 }
 0x6e5   : > { %1842 = vmatpush3.bf16.xpose.msra.mxu0 %v1135_v6  ;;  %1843 = vmatprep.mubr.msk.bf16.mxu0 %vm2219_vm1, %v2218_v2 }
 0x6e6   : > { %1853 = vmatprep.subr.bf16.mxu0 %v2218_v2  ;;  %p2095_p11 = por %p2094_p4, %p2093_p1 }
 0x6ec   : > { %1844 = vmatmul.mubr.msk.bf16.vlgmr.msra.gmra.mrb[20].mxu0 %vm644_vm3, %v1128_v24 }
 0x6ed   : > { %1855 = vmatprep.mubr.msk.bf16.mxu0 %vm2219_vm1, %v2218_v2  ;;  %1854 = vmatpush3.bf16.msra.mxu0 %v1244_v32  ;;  %v1393_v32 = vsub.s32 6, %v2543_v9 }
 0x6ee   : > { %1867 = vmatprep.subr.bf16.mxu0 %v2218_v2 }
 0x7b7   : > { %v1073_v8 = vpop.f32.mrb[16].mxu0 }
 0x7b8   : > { %v1079_v10 = vpack.c.bf16 %v1073_v8, %v1073_v8  ;;  %v1833_v11 = vpop.f32.mrb[17].mxu0  ;;  %v1310_v8 = vrot.slane %v2548_v16, %v1309_v27 }
 0x7b9   : > { %v1076_v13 = vpop.f32.mrb[18].mxu0 }
 0x7ba   : > { %v1834_v15 = vpop.f32.mrb[19].mxu0  ;;  %1838 = vmatmul.mubr.msk.bf16.vlgmr.msra.gmra.mrb[24].mxu1 %vm644_vm3, %v1079_v10  ;;  %v1315_v13 = vrot.slane %v2548_v16, %v1314_v7 }
 0x7bb   : > { %1849 = vmatprep.mubr.msk.bf16.mxu1 %vm2219_vm1, %v2218_v2 }
 0x7bf   : > { %v1171_v17 = vpop.f32.mrb[20].mxu0 }
 0x7c0   : > { %v1177_v18 = vmul.f32 0.35355338, %v1171_v17  ;;  %v1845_v19 = vpop.f32.mrb[21].mxu0 }
 0x7c1   : > { %v1174_v20 = vpop.f32.mrb[22].mxu0  ;;  %v2004_v19 = vld [vmem:[%s2507_s28 + $0x10] sm:$0xff]  }
 0x7c2   : > { %v1846_v21 = vpop.f32.mrb[23].mxu0  ;;  %v1178_v22 = vadd.f32 %v2588_v34, %v1177_v18  ;;  %v2005_v20 = vld [vmem:[%s2507_s28 + $0x18] sm:$0xff]  }
 0x7c3   : > { %v451_v21 = vld [vmem:[%s2512_s24 + $0x8] sm:$0x3]  ;;  %s2833_s24 = sld [smem:[#allocation25_spill]] }
 0x7c4   : > { %v1179_v23 = vsel %vm644_vm3, %v1178_v22, -inf }
 0x7c5   : > { %1180 = vmax.xlane.f32.xlu0 %v1179_v23 }
 0x7c9   : > { %s2834_s12 = smov %s2833_s24  ;;  %s2711_s0 = scalar_lea.hbm %s2833_s24, %s1715_s7 }
 0x852   : > { %v1181_v25 = vpop.xlane.xlu0 %1180 }
 0x853   : > { %v1182_v26 = vsub.f32 %v1178_v22, %v1181_v25  ;;  %v1325_v22 = vrot.slane %v451_v21, %v526_v12 }
 0x855   : > { %v1183_v28 = vmul.f32 1.442695, %v1182_v26 }
 0x857   : > { %2018 = vpow2.f32 %v1183_v28 }
 0x861   : > { %v2019_v29 = vpop.eup %2018 }
 0x862   : > { %v1185_v30 = vsel %vm644_vm3, %v2019_v29, 0.0 }
 0x863   : > { %1186 = vadd.xlane.f32.xlu1 %v1185_v30 }
 0x874   : > { %1191 = vrot.lane.b32.xlu1 %v2597_v60, %s2222_s22 }
 0x88d   : > { %v1120_v34 = vpop.f32.mrb[24].mxu1 }
 0x88e   : > { %v1126_v33 = vadd.f32 %v1120_v34, %v2635_v46  ;;  %v1839_v35 = vpop.f32.mrb[25].mxu1  ;;  %v1394_v34 = vrot.slane %v2548_v16, %v1393_v32 }
 0x88f   : > { %v1123_v36 = vpop.f32.mrb[26].mxu1 }
 0x890   : > { %v1840_v37 = vpop.f32.mrb[27].mxu1 }
 0x8f0   : > { %v1187_v38 = vpop.xlane.xlu1 %1186 }
 0x8f1   : > { %2020 = vrcp.f32 %v1187_v38 }
 0x8f4   : > { %v1192_v39 = vpop.permute.xlu1 %1191 }
 0x8f5   : > { %v1197_v40 = vsel %vm714_vm4, %v1192_v39, 0 }
 0x8f6   : > { %1848 = vmatpush3.bf16.msra.mxu1 %v1197_v40 }
 0x8f7   : > { %1859 = vmatprep.subr.bf16.mxu1 %v2218_v2 }
 0x8fb   : > { %v2021_v60 = vpop.eup %2020 }
 0x8fc   : > { %v1189_v41 = vmul.f32 %v2021_v60, %v2019_v29 }
 0x8fe   : > { %v1190_v42 = vpack.c.bf16 %v1189_v41, %v1189_v41 }
 0x900   : > { %1850 = vmatmul.mubr.msk.bf16.vlgmr.msra.gmra.mrb[28].mxu1 %vm644_vm3, %v1190_v42 }
 0x901   : > { %1863 = vmatprep.mubr.msk.bf16.mxu1 %vm2219_vm1, %v2218_v2  ;;  %1860 = vmatpush3.bf16.msra.mxu1 %v2000_v0 }
 0x902   : > { %1861 = vmatprep.subr.bf16.mxu1 %v2218_v2 }
 0x905   : > { %1862 = vmatpush3.bf16.msra.mxu1 %v2001_v1 }
 0x9d3   : > { %v1233_v43 = vpop.f32.mrb[28].mxu1 }
 0x9d4   : > { %v1239_v44 = vpack.c.bf16 %v1233_v43, %v1233_v43  ;;  %v1851_v45 = vpop.f32.mrb[29].mxu1 }
 0x9d5   : > { %v1236_v46 = vpop.f32.mrb[30].mxu1 }
 0x9d6   : > { %v1852_v47 = vpop.f32.mrb[31].mxu1  ;;  %1856 = vmatmul.mubr.msk.bf16.vlgmr.msra.gmra.mrb[24].mxu0 %vm644_vm3, %v1239_v44  ;;  %v1479_v46 = vsub.s32 7, %v2543_v9 }
 0x9d7   : > { %1875 = vmatprep.mubr.msk.bf16.mxu0 %vm2219_vm1, %v2218_v2  ;;  %1868 = vmatpush3.bf16.msra.mxu0 %v2002_v3 }
 0x9d8   : > { %1869 = vmatprep.subr.bf16.mxu0 %v2218_v2  ;;  %v1480_v47 = vrot.slane %v2548_v16, %v1479_v46 }
 0xaa9   : > { %v1280_v50 = vpop.f32.mrb[24].mxu0 }
 0xaaa   : > { %v1286_v51 = vadd.f32 %v1280_v50, %v1126_v33  ;;  %v1857_v52 = vpop.f32.mrb[25].mxu0 }
 0xaab   : > { %v1283_v53 = vpop.f32.mrb[26].mxu0 }
 0xaac   : > { %v1291_v54 = vadd.f32 %v1290_v49, %v1286_v51  ;;  %v1858_v55 = vpop.f32.mrb[27].mxu0  ;;  %v1485_v49 = vrot.slane %v451_v21, %v466_v14 }
 0xaae   : > { %v1292_v56 = vadd.f32 %v1291_v54, %v2525_v4  ;;  %v2003_v4 = vld [vmem:[%s2507_s28 + $0x8] sm:$0xff]   ;;  %s2832_s28 = sld [smem:[#allocation17_spill]] }
 0xaaf   : > { %1870 = vmatpush3.bf16.msra.mxu0 %v2003_v4 }
 0xab0   : > { %v1293_v57 = vsel %vm480_vm2, %v1292_v56, 0.0  ;;  %1871 = vmatprep.subr.bf16.mxu0 %v2218_v2 }
 0xab1   : > { %1294 = vadd.xlane.f32.xlu1 %v1293_v57 }
 0xab3   : > { %1872 = vmatpush3.bf16.msra.mxu0 %v2004_v19 }
 0xab4   : > { %1873 = vmatprep.subr.bf16.mxu0 %v2218_v2  ;;  %p2835_p0 = scmp.ne.s32.totalorder %s2832_s28, 0 }
 0xab6   : > { %p2088_p7 = pnand %p2087_p10, %p2835_p0 }
 0xab7   : > { %1874 = vmatpush3.bf16.msra.mxu0 %v2005_v20 }
 0xab8   : > { %p2089_p9 = pneg %p2088_p7 }
 0xaba   : > { %p2096_p3 = pnand %p2095_p11, %p2089_p9 }
 0xb3e   : > { %v1295_v58 = vpop.xlane.xlu1 %1294 }
 0xb3f   : > { %v1297_v59 = vmul.f32 0.03125, %v1295_v58 }
 0xb41   : > { %v1298_v61 = vsub.f32 %v1292_v56, %v1297_v59 }
 0xb43   : > { %v1299_v62 = vmul.f32 %v1298_v61, %v1298_v61 }
 0xb45   : > { %v1300_v63 = vsel %vm480_vm2, %v1299_v62, 0.0 }
 0xb46   : > { %1301 = vadd.xlane.f32.xlu0 %v1300_v63 }
 0xbd3   : > { %v1302_v5 = vpop.xlane.xlu0 %1301 }
 0xbd4   : > { %v1303_v6 = vmul.f32 0.03125, %v1302_v5 }
 0xbd6   : > { %v1304_v24 = vadd.f32 1e-05, %v1303_v6 }
 0xbd8   : > { %2022 = vrsqrt.f32 %v1304_v24 }
 0xbe2   : > { %v2023_v10 = vpop.eup %2022 }
 0xbe3   : > { %v1306_v11 = vmul.f32 %v2023_v10, %v1298_v61 }
 0xbe5   : > { %v1311_v15 = vmul.f32 %v1310_v8, %v1306_v11 }
 0xbe7   : > { %v1316_v17 = vadd.f32 %v1315_v13, %v1311_v15 }
 0xbe9   : > { %v1317_v18 = vpack.c.bf16 %v1316_v17, %v1316_v17 }
 0xbeb   : > { %1864 = vmatmul.mubr.msk.bf16.vlgmr.msra.gmra.mrb[32].mxu1 %vm480_vm2, %v1317_v18 }
 0xcbe   : > { %v1375_v23 = vpop.f32.mrb[32].mxu1 }
 0xcbf   : > { %v1376_v25 = vadd.f32 %v1375_v23, %v1325_v22  ;;  %v1865_v26 = vpop.f32.mrb[33].mxu1 }
 0xcc0   : > { %v1378_v28 = vpop.f32.mrb[34].mxu1 }
 0xcc1   : > { %v1381_v29 = vmax.f32 %v1376_v25, 0.0  ;;  %v1866_v30 = vpop.f32.mrb[35].mxu1 }
 0xcc3   : > { %v1382_v31 = vpack.c.bf16 %v1381_v29, %v1381_v29 }
 0xcc5   : > { %1876 = vmatmul.mubr.msk.bf16.vlgmr.msra.gmra.mrb[28].mxu0 %vm1419_vm5, %v1382_v31 }
 0xd98   : > { %v1457_v2 = vpop.f32.mrb[28].mxu0 }
 0xd99   : > { %v1458_v33 = vadd.f32 %v1457_v2, %v1394_v34  ;;  %v1877_v35 = vpop.f32.mrb[29].mxu0 }
 0xd9a   : > { %v1460_v36 = vpop.f32.mrb[30].mxu0 }
 0xd9b   : > { %v1878_v37 = vpop.f32.mrb[31].mxu0  ;;  %v1463_v38 = vadd.f32 %v1458_v33, %v1316_v17 }
 0xd9d   : > { %v1464_v12 = vsel %vm480_vm2, %v1463_v38, 0.0 }
 0xd9e   : > { %1465 = vadd.xlane.f32.xlu0 %v1464_v12 }
 0xe2b   : > { %v1466_v39 = vpop.xlane.xlu0 %1465 }
 0xe2c   : > { %v1467_v40 = vmul.f32 0.03125, %v1466_v39 }
 0xe2e   : > { %v1468_v60 = vsub.f32 %v1463_v38, %v1467_v40 }
 0xe30   : > { %v1469_v41 = vmul.f32 %v1468_v60, %v1468_v60 }
 0xe32   : > { %v1470_v42 = vsel %vm480_vm2, %v1469_v41, 0.0 }
 0xe33   : > { %1471 = vadd.xlane.f32.xlu0 %v1470_v42 }
 0xec0   : > { %v1472_v43 = vpop.xlane.xlu0 %1471 }
 0xec1   : > { %v1473_v44 = vmul.f32 0.03125, %v1472_v43 }
 0xec3   : > { %v1474_v45 = vadd.f32 1e-05, %v1473_v44 }
 0xec5   : > { %2024 = vrsqrt.f32 %v1474_v45 }
 0xecf   : > { %v2025_v48 = vpop.eup %2024 }
 0xed0   : > { %v1476_v50 = vmul.f32 %v2025_v48, %v1468_v60 }
 0xed2   : > { %v1481_v51 = vmul.f32 %v1480_v47, %v1476_v50 }
 0xed4   : > { %v1486_v52 = vadd.f32 %v1485_v49, %v1481_v51 }
 0xed6   : > { %1487 = vst.msk [vmem:[%s2514_s20] sm:$0xff] %vm480_vm2, %v1486_v52 }
 0xed7   : > { %2099 = shalt.err (!%p2096_p3)
}
 0xed8   : > { %s2100_s20 = scalar_lea.hbm %s2711_s0, 128  ;;  %s2104_s18 = scalar_lea.hbm %s2834_s12, 256 }
 0xed9   : > { %p2101_p12 = scmp.ne.s32.totalorder %s2711_s0, %s2100_s20  ;;  %p2105_p6 = scmp.lt.u32.totalorder %s2711_s0, %s2834_s12 }
 0xeda   : > { %p2106_p8 = scmp.lt.u32.totalorder %s2104_s18, %s2100_s20  ;;  %p2108_p10 = scmp.lt.u32.totalorder %s2100_s20, %s2711_s0 }
 0xedb   : > { %p2102_p5 = pnand %p2101_p12, %p2835_p0 }
 0xedc   : > { %p2107_p13 = por %p2106_p8, %p2105_p6 }
 0xedd   : > { %p2103_p2 = pneg %p2102_p5 }
 0xede   : > { %p2109_p7 = por %p2108_p10, %p2107_p13 }
 0xee0   : > { %p2110_p9 = pnand %p2109_p7, %p2103_p2 }
 0xee2   : > { %2113 = shalt.err (!%p2110_p9)
}
 0xee3   : > { %1884 = dma.vmem_to_hbm [thread:$0]  (%p2835_p0), %s2713_s21, 128, %s2711_s0, %s1489_s15  }
 0xee4 PF: > { %s2836_s29 = sld [smem:[#allocation16_spill]]  ;;  %s2837_s30 = sld [smem:[#allocation11_spill]] }
 0xee5   : > { %s2838_s9 = sld [smem:[#allocation18_spill]] }
 0xeea   : > { %p1898_p1 = scmp.ge.s32.totalorder %s2836_s29, 2  ;;  %s1514_s10 = sand.u32 1, %s2837_s30  }
 0xeeb   : > { %p2839_p4 = scmp.ne.s32.totalorder %s2838_s9, 0  ;;  %s1515_s22 = scalar_lea.sflag [#allocation4], %s1514_s10 }
 0xeed   : > { %p1894_p11 = pnand %p1898_p1, %p2839_p4 }
 0xeef   : > { %2167 = dma.done.wait (!%p1894_p11), %s1515_s22, 128  }
 0xef0   : > { %2169 = vsyncadd (!%p1894_p11), %s1515_s22, 4294967168  ;;  %s26_s11 = sadd.s32 1, %s2836_s29   ;;  %s2840_s28 = sld [smem:[#allocation21_spill]] }
 0xef1   : > { %p23_p3 = scmp.ge.s32.totalorder %s26_s11, 6   ;;  %s2841_s27 = sld [smem:[#allocation12_spill]] }
 0xef2   : > { %s2842_s7 = sld [smem:[#allocation13_spill]]  ;;  %s2843_s29 = sld [smem:[#allocation22_spill]] }
 0xef3   : > { %s2844_s30 = sld [smem:[#allocation14_spill]]  ;;  %s2845_s8 = sld [smem:[#allocation15_spill]] }
 0xef4   : > { %s2846_s9 = sld [smem:[#allocation19_spill]]  ;;  %s2847_s10 = sld [smem:[#allocation20_spill]] }
 0xef5   : > { %s2848_s24 = smov %s2176_s25  ;;  %s2849_s25 = smov %s2180_s26 }
 0xef6   : > { %s2850_s26 = smov %s2840_s28  ;;  %25 = sbr.rel (!%p23_p3) target bundleno = 15 (0xf), region = 125 }
 0xef8   : > { %s2851_s28 = smov %s2842_s7 }
 0xefd   :  { %1520 = vsyncpa [#allocation3], 1 }
 0xefe   :  { %1522 = vsyncpa [#allocation3 + $0x1], 1 }
 0xeff   :  { %1523 = vsyncpa [#allocation6], 1 }
 0xf00   :  { %1525 = vsyncpa [#allocation6 + $0x1], 1 }
 0xf01   :  { %1526 = vsyncpa [#allocation4], 1 }
 0xf02   :  { %1528 = vsyncpa [#allocation4 + $0x1], 1 }

</bundles_post_ra>
